<compile_context>
chip_gen: v7x
topology: tpu7x:2x2x1
jax: 0.10.0
libtpu: 0.0.40
codegen_flags: <defaults>
</compile_context>

<pallas_src>
import functools

import jax
import jax.numpy as jnp
from jax import lax
from jax.experimental import pallas as pl
from jax.experimental.pallas import tpu as pltpu


def _lstm_critic_kernel(x_ref,        # (T*Bp, I)  bf16  time-major, batch-padded
                        wih_ref,      # (I, 4H)    bf16  gate cols [i,f,o,g]
                        whh_ref,      # (H, 4H)    bf16  gate cols [i,f,o,g]
                        b_ref,        # (1, 4H)    f32   (b_ih + b_hh), permuted
                        w1_ref,       # (H, 128)   bf16  critic.0 weight^T
                        b1_ref,       # (1, 128)   f32
                        w2_ref,       # (1, 128)   f32   critic.2 weight row
                        b2_ref,       # (1, 1)     f32   SMEM scalar
                        out_ref,      # (Bp, 1)    f32
                        gx_ref):      # (T*Bp, 4H) f32   VMEM scratch
    H = whh_ref.shape[0]
    Bp = out_ref.shape[0]
    T = x_ref.shape[0] // Bp           # static Python int at trace time

    # ---- Hoisted input projection: one MXU pass for all timesteps + bias. ----
    # Stored in a VMEM scratch so the (T*Bp, 4H) f32 block is not held live in
    # vregs across the unrolled recurrence (avoids spill/refill on the serial
    # chain); per-step vld of an (Bp, 4H) slice is trivially hidden.
    gx_ref[...] = (jnp.dot(x_ref[...], wih_ref[...],
                           preferred_element_type=jnp.float32) + b_ref[...])

    # ---- Recurrence, fully unrolled; only h @ W_hh is serially dependent. ----
    h = jnp.zeros((Bp, H), jnp.float32)
    c = jnp.zeros((Bp, H), jnp.float32)
    for t in range(T):
        gates = gx_ref[pl.ds(t * Bp, Bp), :] + jnp.dot(
            h.astype(jnp.bfloat16), whh_ref[...],
            preferred_element_type=jnp.float32)           # (Bp, 4H) f32
        # Gate columns are pre-permuted to [i, f, o, g]: one sigmoid slab + one tanh.
        sig = jax.nn.sigmoid(gates[:, :3 * H])            # (Bp, 3H)
        g_g = jnp.tanh(gates[:, 3 * H:])                  # (Bp, H)
        i_g = sig[:, 0 * H:1 * H]
        f_g = sig[:, 1 * H:2 * H]
        o_g = sig[:, 2 * H:3 * H]
        c = f_g * c + i_g * g_g
        h = o_g * jnp.tanh(c)

    # ---- Critic MLP: Linear(H,128) -> ReLU -> Linear(128,1). ----
    z = jnp.maximum(
        jnp.dot(h.astype(jnp.bfloat16), w1_ref[...],
                preferred_element_type=jnp.float32) + b1_ref[...], 0.0)  # (Bp,128)
    # Linear(128,1) as VPU multiply + lane reduce (keeps the N=1 matmul off MXU).
    out_ref[...] = jnp.sum(z * w2_ref[...], axis=-1, keepdims=True) + b2_ref[0, 0]


@jax.jit
def lstm_critic_forward(x, kparams, hidden_state=None):
    """x: (B, T, I) f32 batch-first.  Returns (value, hidden_state) like PyTorch."""
    B, T, I = x.shape
    H = kparams["w_hh_t"].shape[0]
    Bp = max(8, ((B + 7) // 8) * 8)     # pad batch to fill f32 sublanes

    # Per-call input prep only (all weight prep is one-time in pack_params):
    # time-major, zero-pad batch, flatten so the kernel does a single hoisted
    # input-projection matmul; matmul operand in bf16.
    x_tm = jnp.transpose(x, (1, 0, 2))                       # (T, B, I)
    x_tm = jnp.pad(x_tm, ((0, 0), (0, Bp - B), (0, 0)))      # (T, Bp, I)
    x_flat = x_tm.reshape(T * Bp, I).astype(jnp.bfloat16)

    vmem = pl.BlockSpec(memory_space=pltpu.MemorySpace.VMEM)
    smem = pl.BlockSpec(memory_space=pltpu.MemorySpace.SMEM)

    out = pl.pallas_call(
        _lstm_critic_kernel,
        out_shape=jax.ShapeDtypeStruct((Bp, 1), jnp.float32),
        in_specs=[vmem, vmem, vmem, vmem, vmem, vmem, vmem, smem],
        out_specs=vmem,
        scratch_shapes=[pltpu.VMEM((T * Bp, 4 * H), jnp.float32)],
    )(x_flat,
      kparams["w_ih_t"], kparams["w_hh_t"], kparams["b"],
      kparams["w1_t"], kparams["b1"], kparams["w2"], kparams["b2"])

    value = out[:B]
    if B == 1:                      # mimic PyTorch value.squeeze(0)
        value = value[0]
    return value, hidden_state


def init_raw_params(key, input_size, hidden_size):
    """Deterministic synthetic init matching PyTorch parameter shapes/order."""
    ks = jax.random.split(key, 8)
    H, I = hidden_size, input_size
    s = 1.0 / jnp.sqrt(H)
    return {
        "w_ih": jax.random.uniform(ks[0], (4 * H, I), jnp.float32, -s, s),
        "w_hh": jax.random.uniform(ks[1], (4 * H, H), jnp.float32, -s, s),
        "b_ih": jax.random.uniform(ks[2], (4 * H,), jnp.float32, -s, s),
        "b_hh": jax.random.uniform(ks[3], (4 * H,), jnp.float32, -s, s),
        "w1": jax.random.uniform(ks[4], (128, H), jnp.float32, -s, s),   # Linear(H,128)
        "b1": jax.random.uniform(ks[5], (128,), jnp.float32, -s, s),
        "w2": jax.random.uniform(ks[6], (1, 128), jnp.float32,
                                 -1.0 / jnp.sqrt(128.0), 1.0 / jnp.sqrt(128.0)),
        "b2": jax.random.uniform(ks[7], (1,), jnp.float32,
                                 -1.0 / jnp.sqrt(128.0), 1.0 / jnp.sqrt(128.0)),
    }


def pack_params(raw):
    """One-time weight prep: transpose, gate-permute to [i,f,o,g], cast to the
    kernel dtypes, reshape biases.  The per-call wrapper does zero weight work."""
    H = raw["w_hh"].shape[1]
    # PyTorch gate row order is [i, f, g, o]; permute rows to [i, f, o, g].
    perm = jnp.concatenate([jnp.arange(0, 2 * H),          # i, f
                            jnp.arange(3 * H, 4 * H),      # o
                            jnp.arange(2 * H, 3 * H)])     # g
    return {
        "w_ih_t": raw["w_ih"][perm, :].T.astype(jnp.bfloat16),        # (I, 4H)
        "w_hh_t": raw["w_hh"][perm, :].T.astype(jnp.bfloat16),        # (H, 4H)
        "b": (raw["b_ih"] + raw["b_hh"])[perm].reshape(1, 4 * H).astype(jnp.float32),
        "w1_t": raw["w1"].T.astype(jnp.bfloat16),                     # (H, 128)
        "b1": raw["b1"].reshape(1, -1).astype(jnp.float32),           # (1, 128)
        "w2": raw["w2"].reshape(1, -1).astype(jnp.float32),           # (1, 128)
        "b2": raw["b2"].reshape(1, 1).astype(jnp.float32),            # (1, 1)
    }


def _reference(x, raw):
    """Pure-JAX f32 reference of the PyTorch forward (original gate order)."""
    B, T, I = x.shape
    H = raw["w_hh"].shape[1]
    w_ih_t, w_hh_t = raw["w_ih"].T, raw["w_hh"].T
    b = (raw["b_ih"] + raw["b_hh"])[None, :]

    def step(carry, x_t):
        h, c = carry
        g = x_t @ w_ih_t + h @ w_hh_t + b
        i = jax.nn.sigmoid(g[:, :H])
        f = jax.nn.sigmoid(g[:, H:2 * H])
        gg = jnp.tanh(g[:, 2 * H:3 * H])
        o = jax.nn.sigmoid(g[:, 3 * H:])
        c = f * c + i * gg
        h = o * jnp.tanh(c)
        return (h, c), None

    init = (jnp.zeros((B, H), jnp.float32), jnp.zeros((B, H), jnp.float32))
    (h, _), _ = lax.scan(step, init, jnp.transpose(x, (1, 0, 2)))
    z = jnp.maximum(h @ raw["w1"].T + raw["b1"][None, :], 0.0)
    return z @ raw["w2"].T + raw["b2"][None, :]


if __name__ == "__main__":
    # observation_space.shape = (num_frame, max_notes, note_feature) = (8, 4, 8)
    num_frame, max_notes, note_feature = 8, 4, 8
    hidden_size = 128
    batch = 2
    input_size = max_notes * note_feature   # 32

    key = jax.random.PRNGKey(0)
    kp, kx = jax.random.split(key)
    raw = init_raw_params(kp, input_size, hidden_size)
    kparams = pack_params(raw)              # one-time: no per-call casts/reshapes
    # x already flattened per-frame, as the LSTM's input_size implies.
    x = jax.random.normal(kx, (batch, num_frame, input_size), jnp.float32)

    value, hidden_state = lstm_critic_forward(x, kparams)
    value = jax.block_until_ready(value)
    assert value.shape == (batch, 1), value.shape

    # Loose tolerance: bf16 matmul operands with f32 accumulation (~1e-2 drift).
    ref = _reference(x, raw)
    assert jnp.allclose(value, ref, atol=5e-2, rtol=5e-2)

    print("KERNEL_OK")
</pallas_src>

<mosaic_0001>
module attributes {stable_mosaic.version = 11 : i64} {
  func.func @_lstm_critic_kernel(%arg0: memref<64x32xbf16, #tpu.memory_space<vmem>>, %arg1: memref<32x512xbf16, #tpu.memory_space<vmem>>, %arg2: memref<128x512xbf16, #tpu.memory_space<vmem>>, %arg3: memref<1x512xf32, #tpu.memory_space<vmem>>, %arg4: memref<128x128xbf16, #tpu.memory_space<vmem>>, %arg5: memref<1x128xf32, #tpu.memory_space<vmem>>, %arg6: memref<1x128xf32, #tpu.memory_space<vmem>>, %arg7: memref<1x1xf32, #tpu.memory_space<smem>>, %arg8: memref<8x1xf32, #tpu.memory_space<vmem>>, %arg9: memref<64x512xf32, #tpu.memory_space<vmem>>) attributes {dimension_semantics = [], scalar_prefetch = 0 : i64, scratch_operands = 1 : i64, tpu.core_type = #tpu.core_type<tc>} {
    %c0 = arith.constant 0 : index
    %c0_0 = arith.constant 0 : index
    %0 = vector.load %arg0[%c0, %c0_0] : memref<64x32xbf16, #tpu.memory_space<vmem>>, vector<64x32xbf16>
    %c0_1 = arith.constant 0 : index
    %c0_2 = arith.constant 0 : index
    %1 = vector.load %arg1[%c0_1, %c0_2] : memref<32x512xbf16, #tpu.memory_space<vmem>>, vector<32x512xbf16>
    %cst = arith.constant dense<0.000000e+00> : vector<64x512xf32>
    %2 = tpu.matmul %0, %1, %cst {dimension_numbers = #tpu.dot_dimension_numbers<[1], [0], [0], [1], [0, 0, 1, 1], [], []>} : vector<64x32xbf16>, vector<32x512xbf16>, vector<64x512xf32> -> vector<64x512xf32>
    %c0_3 = arith.constant 0 : index
    %c0_4 = arith.constant 0 : index
    %3 = vector.load %arg3[%c0_3, %c0_4] : memref<1x512xf32, #tpu.memory_space<vmem>>, vector<1x512xf32>
    %4 = vector.broadcast %3 : vector<1x512xf32> to vector<64x512xf32>
    %5 = arith.addf %2, %4 : vector<64x512xf32>
    %c0_5 = arith.constant 0 : index
    %c0_6 = arith.constant 0 : index
    %6 = vector.load %arg9[%c0_5, %c0_6] : memref<64x512xf32, #tpu.memory_space<vmem>>, vector<64x512xf32>
    tpu.vector_store %arg9[%c0_5, %c0_6], %5 {strides = array<i32>} : memref<64x512xf32, #tpu.memory_space<vmem>>, vector<64x512xf32>,
    %cst_7 = arith.constant 0.000000e+00 : f32
    %7 = vector.broadcast %cst_7 : f32 to vector<8x128xf32>
    %cst_8 = arith.constant 0.000000e+00 : f32
    %8 = vector.broadcast %cst_8 : f32 to vector<8x128xf32>
    %c0_9 = arith.constant 0 : index
    %c0_10 = arith.constant 0 : index
    %9 = vector.load %arg9[%c0_9, %c0_10] : memref<64x512xf32, #tpu.memory_space<vmem>>, vector<8x512xf32>
    %10 = arith.truncf %7 : vector<8x128xf32> to vector<8x128xbf16>
    %c0_11 = arith.constant 0 : index
    %c0_12 = arith.constant 0 : index
    %11 = vector.load %arg2[%c0_11, %c0_12] : memref<128x512xbf16, #tpu.memory_space<vmem>>, vector<128x512xbf16>
    %cst_13 = arith.constant dense<0.000000e+00> : vector<8x512xf32>
    %12 = tpu.matmul %10, %11, %cst_13 {dimension_numbers = #tpu.dot_dimension_numbers<[1], [0], [0], [1], [0, 0, 1, 1], [], []>} : vector<8x128xbf16>, vector<128x512xbf16>, vector<8x512xf32> -> vector<8x512xf32>
    %13 = arith.addf %9, %12 : vector<8x512xf32>
    %14 = vector.extract_strided_slice %13 {offsets = [0, 0], sizes = [8, 384], strides = [1, 1]} : vector<8x512xf32> to vector<8x384xf32>
    %15 = arith.negf %14 : vector<8x384xf32>
    %16 = math.exp %15 : vector<8x384xf32>
    %cst_14 = arith.constant 1.000000e+00 : f32
    %17 = vector.broadcast %cst_14 : f32 to vector<8x384xf32>
    %18 = arith.addf %17, %16 : vector<8x384xf32>
    %19 = arith.divf %17, %18 : vector<8x384xf32>
    %20 = vector.extract_strided_slice %13 {offsets = [0, 384], sizes = [8, 128], strides = [1, 1]} : vector<8x512xf32> to vector<8x128xf32>
    %21 = math.tanh %20 : vector<8x128xf32>
    %22 = vector.extract_strided_slice %19 {offsets = [0, 0], sizes = [8, 128], strides = [1, 1]} : vector<8x384xf32> to vector<8x128xf32>
    %23 = vector.extract_strided_slice %19 {offsets = [0, 128], sizes = [8, 128], strides = [1, 1]} : vector<8x384xf32> to vector<8x128xf32>
    %24 = vector.extract_strided_slice %19 {offsets = [0, 256], sizes = [8, 128], strides = [1, 1]} : vector<8x384xf32> to vector<8x128xf32>
    %25 = arith.mulf %23, %8 : vector<8x128xf32>
    %26 = arith.mulf %22, %21 : vector<8x128xf32>
    %27 = arith.addf %25, %26 : vector<8x128xf32>
    %28 = math.tanh %27 : vector<8x128xf32>
    %29 = arith.mulf %24, %28 : vector<8x128xf32>
    %c8 = arith.constant 8 : index
    %c0_15 = arith.constant 0 : index
    %30 = vector.load %arg9[%c8, %c0_15] : memref<64x512xf32, #tpu.memory_space<vmem>>, vector<8x512xf32>
    %31 = arith.truncf %29 : vector<8x128xf32> to vector<8x128xbf16>
    %c0_16 = arith.constant 0 : index
    %c0_17 = arith.constant 0 : index
    %32 = vector.load %arg2[%c0_16, %c0_17] : memref<128x512xbf16, #tpu.memory_space<vmem>>, vector<128x512xbf16>
    %cst_18 = arith.constant dense<0.000000e+00> : vector<8x512xf32>
    %33 = tpu.matmul %31, %32, %cst_18 {dimension_numbers = #tpu.dot_dimension_numbers<[1], [0], [0], [1], [0, 0, 1, 1], [], []>} : vector<8x128xbf16>, vector<128x512xbf16>, vector<8x512xf32> -> vector<8x512xf32>
    %34 = arith.addf %30, %33 : vector<8x512xf32>
    %35 = vector.extract_strided_slice %34 {offsets = [0, 0], sizes = [8, 384], strides = [1, 1]} : vector<8x512xf32> to vector<8x384xf32>
    %36 = arith.negf %35 : vector<8x384xf32>
    %37 = math.exp %36 : vector<8x384xf32>
    %cst_19 = arith.constant 1.000000e+00 : f32
    %38 = vector.broadcast %cst_19 : f32 to vector<8x384xf32>
    %39 = arith.addf %38, %37 : vector<8x384xf32>
    %40 = arith.divf %38, %39 : vector<8x384xf32>
    %41 = vector.extract_strided_slice %34 {offsets = [0, 384], sizes = [8, 128], strides = [1, 1]} : vector<8x512xf32> to vector<8x128xf32>
    %42 = math.tanh %41 : vector<8x128xf32>
    %43 = vector.extract_strided_slice %40 {offsets = [0, 0], sizes = [8, 128], strides = [1, 1]} : vector<8x384xf32> to vector<8x128xf32>
    %44 = vector.extract_strided_slice %40 {offsets = [0, 128], sizes = [8, 128], strides = [1, 1]} : vector<8x384xf32> to vector<8x128xf32>
    %45 = vector.extract_strided_slice %40 {offsets = [0, 256], sizes = [8, 128], strides = [1, 1]} : vector<8x384xf32> to vector<8x128xf32>
    %46 = arith.mulf %44, %27 : vector<8x128xf32>
    %47 = arith.mulf %43, %42 : vector<8x128xf32>
    %48 = arith.addf %46, %47 : vector<8x128xf32>
    %49 = math.tanh %48 : vector<8x128xf32>
    %50 = arith.mulf %45, %49 : vector<8x128xf32>
    %c16 = arith.constant 16 : index
    %c0_20 = arith.constant 0 : index
    %51 = vector.load %arg9[%c16, %c0_20] : memref<64x512xf32, #tpu.memory_space<vmem>>, vector<8x512xf32>
    %52 = arith.truncf %50 : vector<8x128xf32> to vector<8x128xbf16>
    %c0_21 = arith.constant 0 : index
    %c0_22 = arith.constant 0 : index
    %53 = vector.load %arg2[%c0_21, %c0_22] : memref<128x512xbf16, #tpu.memory_space<vmem>>, vector<128x512xbf16>
    %cst_23 = arith.constant dense<0.000000e+00> : vector<8x512xf32>
    %54 = tpu.matmul %52, %53, %cst_23 {dimension_numbers = #tpu.dot_dimension_numbers<[1], [0], [0], [1], [0, 0, 1, 1], [], []>} : vector<8x128xbf16>, vector<128x512xbf16>, vector<8x512xf32> -> vector<8x512xf32>
    %55 = arith.addf %51, %54 : vector<8x512xf32>
    %56 = vector.extract_strided_slice %55 {offsets = [0, 0], sizes = [8, 384], strides = [1, 1]} : vector<8x512xf32> to vector<8x384xf32>
    %57 = arith.negf %56 : vector<8x384xf32>
    %58 = math.exp %57 : vector<8x384xf32>
    %cst_24 = arith.constant 1.000000e+00 : f32
    %59 = vector.broadcast %cst_24 : f32 to vector<8x384xf32>
    %60 = arith.addf %59, %58 : vector<8x384xf32>
    %61 = arith.divf %59, %60 : vector<8x384xf32>
    %62 = vector.extract_strided_slice %55 {offsets = [0, 384], sizes = [8, 128], strides = [1, 1]} : vector<8x512xf32> to vector<8x128xf32>
    %63 = math.tanh %62 : vector<8x128xf32>
    %64 = vector.extract_strided_slice %61 {offsets = [0, 0], sizes = [8, 128], strides = [1, 1]} : vector<8x384xf32> to vector<8x128xf32>
    %65 = vector.extract_strided_slice %61 {offsets = [0, 128], sizes = [8, 128], strides = [1, 1]} : vector<8x384xf32> to vector<8x128xf32>
    %66 = vector.extract_strided_slice %61 {offsets = [0, 256], sizes = [8, 128], strides = [1, 1]} : vector<8x384xf32> to vector<8x128xf32>
    %67 = arith.mulf %65, %48 : vector<8x128xf32>
    %68 = arith.mulf %64, %63 : vector<8x128xf32>
    %69 = arith.addf %67, %68 : vector<8x128xf32>
    %70 = math.tanh %69 : vector<8x128xf32>
    %71 = arith.mulf %66, %70 : vector<8x128xf32>
    %c24 = arith.constant 24 : index
    %c0_25 = arith.constant 0 : index
    %72 = vector.load %arg9[%c24, %c0_25] : memref<64x512xf32, #tpu.memory_space<vmem>>, vector<8x512xf32>
    %73 = arith.truncf %71 : vector<8x128xf32> to vector<8x128xbf16>
    %c0_26 = arith.constant 0 : index
    %c0_27 = arith.constant 0 : index
    %74 = vector.load %arg2[%c0_26, %c0_27] : memref<128x512xbf16, #tpu.memory_space<vmem>>, vector<128x512xbf16>
    %cst_28 = arith.constant dense<0.000000e+00> : vector<8x512xf32>
    %75 = tpu.matmul %73, %74, %cst_28 {dimension_numbers = #tpu.dot_dimension_numbers<[1], [0], [0], [1], [0, 0, 1, 1], [], []>} : vector<8x128xbf16>, vector<128x512xbf16>, vector<8x512xf32> -> vector<8x512xf32>
    %76 = arith.addf %72, %75 : vector<8x512xf32>
    %77 = vector.extract_strided_slice %76 {offsets = [0, 0], sizes = [8, 384], strides = [1, 1]} : vector<8x512xf32> to vector<8x384xf32>
    %78 = arith.negf %77 : vector<8x384xf32>
    %79 = math.exp %78 : vector<8x384xf32>
    %cst_29 = arith.constant 1.000000e+00 : f32
    %80 = vector.broadcast %cst_29 : f32 to vector<8x384xf32>
    %81 = arith.addf %80, %79 : vector<8x384xf32>
    %82 = arith.divf %80, %81 : vector<8x384xf32>
    %83 = vector.extract_strided_slice %76 {offsets = [0, 384], sizes = [8, 128], strides = [1, 1]} : vector<8x512xf32> to vector<8x128xf32>
    %84 = math.tanh %83 : vector<8x128xf32>
    %85 = vector.extract_strided_slice %82 {offsets = [0, 0], sizes = [8, 128], strides = [1, 1]} : vector<8x384xf32> to vector<8x128xf32>
    %86 = vector.extract_strided_slice %82 {offsets = [0, 128], sizes = [8, 128], strides = [1, 1]} : vector<8x384xf32> to vector<8x128xf32>
    %87 = vector.extract_strided_slice %82 {offsets = [0, 256], sizes = [8, 128], strides = [1, 1]} : vector<8x384xf32> to vector<8x128xf32>
    %88 = arith.mulf %86, %69 : vector<8x128xf32>
    %89 = arith.mulf %85, %84 : vector<8x128xf32>
    %90 = arith.addf %88, %89 : vector<8x128xf32>
    %91 = math.tanh %90 : vector<8x128xf32>
    %92 = arith.mulf %87, %91 : vector<8x128xf32>
    %c32 = arith.constant 32 : index
    %c0_30 = arith.constant 0 : index
    %93 = vector.load %arg9[%c32, %c0_30] : memref<64x512xf32, #tpu.memory_space<vmem>>, vector<8x512xf32>
    %94 = arith.truncf %92 : vector<8x128xf32> to vector<8x128xbf16>
    %c0_31 = arith.constant 0 : index
    %c0_32 = arith.constant 0 : index
    %95 = vector.load %arg2[%c0_31, %c0_32] : memref<128x512xbf16, #tpu.memory_space<vmem>>, vector<128x512xbf16>
    %cst_33 = arith.constant dense<0.000000e+00> : vector<8x512xf32>
    %96 = tpu.matmul %94, %95, %cst_33 {dimension_numbers = #tpu.dot_dimension_numbers<[1], [0], [0], [1], [0, 0, 1, 1], [], []>} : vector<8x128xbf16>, vector<128x512xbf16>, vector<8x512xf32> -> vector<8x512xf32>
    %97 = arith.addf %93, %96 : vector<8x512xf32>
    %98 = vector.extract_strided_slice %97 {offsets = [0, 0], sizes = [8, 384], strides = [1, 1]} : vector<8x512xf32> to vector<8x384xf32>
    %99 = arith.negf %98 : vector<8x384xf32>
    %100 = math.exp %99 : vector<8x384xf32>
    %cst_34 = arith.constant 1.000000e+00 : f32
    %101 = vector.broadcast %cst_34 : f32 to vector<8x384xf32>
    %102 = arith.addf %101, %100 : vector<8x384xf32>
    %103 = arith.divf %101, %102 : vector<8x384xf32>
    %104 = vector.extract_strided_slice %97 {offsets = [0, 384], sizes = [8, 128], strides = [1, 1]} : vector<8x512xf32> to vector<8x128xf32>
    %105 = math.tanh %104 : vector<8x128xf32>
    %106 = vector.extract_strided_slice %103 {offsets = [0, 0], sizes = [8, 128], strides = [1, 1]} : vector<8x384xf32> to vector<8x128xf32>
    %107 = vector.extract_strided_slice %103 {offsets = [0, 128], sizes = [8, 128], strides = [1, 1]} : vector<8x384xf32> to vector<8x128xf32>
    %108 = vector.extract_strided_slice %103 {offsets = [0, 256], sizes = [8, 128], strides = [1, 1]} : vector<8x384xf32> to vector<8x128xf32>
    %109 = arith.mulf %107, %90 : vector<8x128xf32>
    %110 = arith.mulf %106, %105 : vector<8x128xf32>
    %111 = arith.addf %109, %110 : vector<8x128xf32>
    %112 = math.tanh %111 : vector<8x128xf32>
    %113 = arith.mulf %108, %112 : vector<8x128xf32>
    %c40 = arith.constant 40 : index
    %c0_35 = arith.constant 0 : index
    %114 = vector.load %arg9[%c40, %c0_35] : memref<64x512xf32, #tpu.memory_space<vmem>>, vector<8x512xf32>
    %115 = arith.truncf %113 : vector<8x128xf32> to vector<8x128xbf16>
    %c0_36 = arith.constant 0 : index
    %c0_37 = arith.constant 0 : index
    %116 = vector.load %arg2[%c0_36, %c0_37] : memref<128x512xbf16, #tpu.memory_space<vmem>>, vector<128x512xbf16>
    %cst_38 = arith.constant dense<0.000000e+00> : vector<8x512xf32>
    %117 = tpu.matmul %115, %116, %cst_38 {dimension_numbers = #tpu.dot_dimension_numbers<[1], [0], [0], [1], [0, 0, 1, 1], [], []>} : vector<8x128xbf16>, vector<128x512xbf16>, vector<8x512xf32> -> vector<8x512xf32>
    %118 = arith.addf %114, %117 : vector<8x512xf32>
    %119 = vector.extract_strided_slice %118 {offsets = [0, 0], sizes = [8, 384], strides = [1, 1]} : vector<8x512xf32> to vector<8x384xf32>
    %120 = arith.negf %119 : vector<8x384xf32>
    %121 = math.exp %120 : vector<8x384xf32>
    %cst_39 = arith.constant 1.000000e+00 : f32
    %122 = vector.broadcast %cst_39 : f32 to vector<8x384xf32>
    %123 = arith.addf %122, %121 : vector<8x384xf32>
    %124 = arith.divf %122, %123 : vector<8x384xf32>
    %125 = vector.extract_strided_slice %118 {offsets = [0, 384], sizes = [8, 128], strides = [1, 1]} : vector<8x512xf32> to vector<8x128xf32>
    %126 = math.tanh %125 : vector<8x128xf32>
    %127 = vector.extract_strided_slice %124 {offsets = [0, 0], sizes = [8, 128], strides = [1, 1]} : vector<8x384xf32> to vector<8x128xf32>
    %128 = vector.extract_strided_slice %124 {offsets = [0, 128], sizes = [8, 128], strides = [1, 1]} : vector<8x384xf32> to vector<8x128xf32>
    %129 = vector.extract_strided_slice %124 {offsets = [0, 256], sizes = [8, 128], strides = [1, 1]} : vector<8x384xf32> to vector<8x128xf32>
    %130 = arith.mulf %128, %111 : vector<8x128xf32>
    %131 = arith.mulf %127, %126 : vector<8x128xf32>
    %132 = arith.addf %130, %131 : vector<8x128xf32>
    %133 = math.tanh %132 : vector<8x128xf32>
    %134 = arith.mulf %129, %133 : vector<8x128xf32>
    %c48 = arith.constant 48 : index
    %c0_40 = arith.constant 0 : index
    %135 = vector.load %arg9[%c48, %c0_40] : memref<64x512xf32, #tpu.memory_space<vmem>>, vector<8x512xf32>
    %136 = arith.truncf %134 : vector<8x128xf32> to vector<8x128xbf16>
    %c0_41 = arith.constant 0 : index
    %c0_42 = arith.constant 0 : index
    %137 = vector.load %arg2[%c0_41, %c0_42] : memref<128x512xbf16, #tpu.memory_space<vmem>>, vector<128x512xbf16>
    %cst_43 = arith.constant dense<0.000000e+00> : vector<8x512xf32>
    %138 = tpu.matmul %136, %137, %cst_43 {dimension_numbers = #tpu.dot_dimension_numbers<[1], [0], [0], [1], [0, 0, 1, 1], [], []>} : vector<8x128xbf16>, vector<128x512xbf16>, vector<8x512xf32> -> vector<8x512xf32>
    %139 = arith.addf %135, %138 : vector<8x512xf32>
    %140 = vector.extract_strided_slice %139 {offsets = [0, 0], sizes = [8, 384], strides = [1, 1]} : vector<8x512xf32> to vector<8x384xf32>
    %141 = arith.negf %140 : vector<8x384xf32>
    %142 = math.exp %141 : vector<8x384xf32>
    %cst_44 = arith.constant 1.000000e+00 : f32
    %143 = vector.broadcast %cst_44 : f32 to vector<8x384xf32>
    %144 = arith.addf %143, %142 : vector<8x384xf32>
    %145 = arith.divf %143, %144 : vector<8x384xf32>
    %146 = vector.extract_strided_slice %139 {offsets = [0, 384], sizes = [8, 128], strides = [1, 1]} : vector<8x512xf32> to vector<8x128xf32>
    %147 = math.tanh %146 : vector<8x128xf32>
    %148 = vector.extract_strided_slice %145 {offsets = [0, 0], sizes = [8, 128], strides = [1, 1]} : vector<8x384xf32> to vector<8x128xf32>
    %149 = vector.extract_strided_slice %145 {offsets = [0, 128], sizes = [8, 128], strides = [1, 1]} : vector<8x384xf32> to vector<8x128xf32>
    %150 = vector.extract_strided_slice %145 {offsets = [0, 256], sizes = [8, 128], strides = [1, 1]} : vector<8x384xf32> to vector<8x128xf32>
    %151 = arith.mulf %149, %132 : vector<8x128xf32>
    %152 = arith.mulf %148, %147 : vector<8x128xf32>
    %153 = arith.addf %151, %152 : vector<8x128xf32>
    %154 = math.tanh %153 : vector<8x128xf32>
    %155 = arith.mulf %150, %154 : vector<8x128xf32>
    %c56 = arith.constant 56 : index
    %c0_45 = arith.constant 0 : index
    %156 = vector.load %arg9[%c56, %c0_45] : memref<64x512xf32, #tpu.memory_space<vmem>>, vector<8x512xf32>
    %157 = arith.truncf %155 : vector<8x128xf32> to vector<8x128xbf16>
    %c0_46 = arith.constant 0 : index
    %c0_47 = arith.constant 0 : index
    %158 = vector.load %arg2[%c0_46, %c0_47] : memref<128x512xbf16, #tpu.memory_space<vmem>>, vector<128x512xbf16>
    %cst_48 = arith.constant dense<0.000000e+00> : vector<8x512xf32>
    %159 = tpu.matmul %157, %158, %cst_48 {dimension_numbers = #tpu.dot_dimension_numbers<[1], [0], [0], [1], [0, 0, 1, 1], [], []>} : vector<8x128xbf16>, vector<128x512xbf16>, vector<8x512xf32> -> vector<8x512xf32>
    %160 = arith.addf %156, %159 : vector<8x512xf32>
    %161 = vector.extract_strided_slice %160 {offsets = [0, 0], sizes = [8, 384], strides = [1, 1]} : vector<8x512xf32> to vector<8x384xf32>
    %162 = arith.negf %161 : vector<8x384xf32>
    %163 = math.exp %162 : vector<8x384xf32>
    %cst_49 = arith.constant 1.000000e+00 : f32
    %164 = vector.broadcast %cst_49 : f32 to vector<8x384xf32>
    %165 = arith.addf %164, %163 : vector<8x384xf32>
    %166 = arith.divf %164, %165 : vector<8x384xf32>
    %167 = vector.extract_strided_slice %160 {offsets = [0, 384], sizes = [8, 128], strides = [1, 1]} : vector<8x512xf32> to vector<8x128xf32>
    %168 = math.tanh %167 : vector<8x128xf32>
    %169 = vector.extract_strided_slice %166 {offsets = [0, 0], sizes = [8, 128], strides = [1, 1]} : vector<8x384xf32> to vector<8x128xf32>
    %170 = vector.extract_strided_slice %166 {offsets = [0, 128], sizes = [8, 128], strides = [1, 1]} : vector<8x384xf32> to vector<8x128xf32>
    %171 = vector.extract_strided_slice %166 {offsets = [0, 256], sizes = [8, 128], strides = [1, 1]} : vector<8x384xf32> to vector<8x128xf32>
    %172 = arith.mulf %170, %153 : vector<8x128xf32>
    %173 = arith.mulf %169, %168 : vector<8x128xf32>
    %174 = arith.addf %172, %173 : vector<8x128xf32>
    %175 = math.tanh %174 : vector<8x128xf32>
    %176 = arith.mulf %171, %175 : vector<8x128xf32>
    %177 = arith.truncf %176 : vector<8x128xf32> to vector<8x128xbf16>
    %c0_50 = arith.constant 0 : index
    %c0_51 = arith.constant 0 : index
    %178 = vector.load %arg4[%c0_50, %c0_51] : memref<128x128xbf16, #tpu.memory_space<vmem>>, vector<128x128xbf16>
    %cst_52 = arith.constant dense<0.000000e+00> : vector<8x128xf32>
    %179 = tpu.matmul %177, %178, %cst_52 {dimension_numbers = #tpu.dot_dimension_numbers<[1], [0], [0], [1], [0, 0, 1, 1], [], []>} : vector<8x128xbf16>, vector<128x128xbf16>, vector<8x128xf32> -> vector<8x128xf32>
    %c0_53 = arith.constant 0 : index
    %c0_54 = arith.constant 0 : index
    %180 = vector.load %arg5[%c0_53, %c0_54] : memref<1x128xf32, #tpu.memory_space<vmem>>, vector<1x128xf32>
    %181 = vector.broadcast %180 : vector<1x128xf32> to vector<8x128xf32>
    %182 = arith.addf %179, %181 : vector<8x128xf32>
    %cst_55 = arith.constant 0.000000e+00 : f32
    %183 = vector.broadcast %cst_55 : f32 to vector<8x128xf32>
    %184 = arith.maximumf %182, %183 : vector<8x128xf32>
    %c0_56 = arith.constant 0 : index
    %c0_57 = arith.constant 0 : index
    %185 = vector.load %arg6[%c0_56, %c0_57] : memref<1x128xf32, #tpu.memory_space<vmem>>, vector<1x128xf32>
    %186 = vector.broadcast %185 : vector<1x128xf32> to vector<8x128xf32>
    %187 = arith.mulf %184, %186 : vector<8x128xf32>
    %cst_58 = arith.constant dense<0.000000e+00> : vector<8xf32>
    %188 = vector.multi_reduction <add>, %187, %cst_58 [1] : vector<8x128xf32> to vector<8xf32>
    %189 = vector.shape_cast %188 : vector<8xf32> to vector<8x1xf32>
    %c0_59 = arith.constant 0 : index
    %c0_60 = arith.constant 0 : index
    %190 = memref.load %arg7[%c0_59, %c0_60] : memref<1x1xf32, #tpu.memory_space<smem>>
    %191 = vector.broadcast %190 : f32 to vector<8x1xf32>
    %192 = arith.addf %189, %191 : vector<8x1xf32>
    %c0_61 = arith.constant 0 : index
    %c0_62 = arith.constant 0 : index
    %193 = vector.load %arg8[%c0_61, %c0_62] : memref<8x1xf32, #tpu.memory_space<vmem>>, vector<8x1xf32>
    tpu.vector_store %arg8[%c0_61, %c0_62], %192 {strides = array<i32>} : memref<8x1xf32, #tpu.memory_space<vmem>>, vector<8x1xf32>,
    return
  }
}

</mosaic_0001>

<bundles_post_ra>
// kernel: lstm_critic_forward.1
= control target key start
LH: loop header
LB: loop body
LE: loop exit
PB: predicated region body
PF: predicated region fallthrough
CT: control target
= control target key end

     0   :  { %14 = vsyncpa [#allocation5], 0  ;;  %s2676_s0 = inlined_call_operand.vmem [shape: bf16[64,32], index: 0, kind: input, shape index: {}]   ;;  %s2677_s1 = inlined_call_operand.vmem [shape: bf16[32,512], index: 1, kind: input, shape index: {}]   ;;  %s2678_s2 = inlined_call_operand.hbm [shape: bf16[128,512], index: 2, kind: input, shape index: {}]   ;;  %s2679_s3 = inlined_call_operand.vmem [shape: f32[1,512], index: 3, kind: input, shape index: {}]   ;;  %s2680_s4 = inlined_call_operand.hbm [shape: bf16[128,128], index: 4, kind: input, shape index: {}]   ;;  %s2681_s5 = inlined_call_operand.vmem [shape: f32[1,128], index: 5, kind: input, shape index: {}]   ;;  %s2682_s6 = inlined_call_operand.vmem [shape: f32[1,128], index: 6, kind: input, shape index: {}]   ;;  %s2683_s7 = inlined_call_operand.<no memory space> [shape: f32[1,1], index: 7, kind: input, shape index: {}]   ;;  %s2684_s8 = inlined_call_operand.vmem [shape: f32[8,1], index: 8, kind: output, shape index: {}]  }
   0x1   :  { %15 = vsyncpa [#allocation7], 0  ;;  %s1997_s27 = smov [#allocation4]   ;;  %s1949_s9 = scalar_lea.hbm %s2678_s2, 4096 }
   0x2   :  { %s25_s28 = sshll.u32 %s1997_s27, 4  ;;  %p1950_p0 = scmp.ne.s32.totalorder %s2678_s2, %s1949_s9  ;;  %s26_s28 = int_to_ptr.vmem [resolvable:$true] %s25_s28 }
   0x3   :  { %p1953_p1 = scmp.lt.u32.totalorder %s1949_s9, %s2678_s2 }
   0x5   :  { %p1955_p2 = pnand %p1953_p1, %p1950_p0 }
   0x7   :  { %1958 = shalt.err (!%p1955_p2)
}
   0x8   :  { %s1959_s14 = scalar_lea.vmem %s26_s28, 4096  ;;  %p1964_p4 = scmp.lt.s32.totalorder %s26_s28, %s26_s28 }
   0x9   :  { %p1960_p3 = scmp.ne.s32.totalorder %s26_s28, %s1959_s14  ;;  %p1965_p5 = scmp.lt.s32.totalorder %s1959_s14, %s1959_s14 }
   0xb   :  { %p1966_p6 = por %p1965_p5, %p1964_p4 }
   0xd   :  { %p1967_p7 = pnand %p1966_p6, %p1960_p3 }
   0xf   :  { %1970 = shalt.err (!%p1967_p7)
}
  0x10   :  { %s1998_s15 = smov 256   ;;  %s1999_s16 = smov 16  }
  0x11   :  { %31 = dma.hbm_to_vmem [thread:$0]  %s2678_s2, 4096, %s26_s28, [#allocation5], %s1998_s15, %s1998_s15, %s1999_s16  }
  0x12   :  { %s2000_s19 = smov [#allocation6]   ;;  %s1971_s23 = scalar_lea.hbm %s2680_s4, 1024 }
  0x13   :  { %s39_s20 = sshll.u32 %s2000_s19, 4  ;;  %p1972_p8 = scmp.ne.s32.totalorder %s2680_s4, %s1971_s23  ;;  %s40_s20 = int_to_ptr.vmem [resolvable:$true] %s39_s20 }
  0x14   :  { %p1975_p9 = scmp.lt.u32.totalorder %s1971_s23, %s2680_s4 }
  0x16   :  { %p1977_p10 = pnand %p1975_p9, %p1972_p8 }
  0x18   :  { %1980 = shalt.err (!%p1977_p10)
}
  0x19   :  { %s1981_s29 = scalar_lea.vmem %s40_s20, 1024  ;;  %p1986_p12 = scmp.lt.s32.totalorder %s40_s20, %s40_s20 }
  0x1a   :  { %p1982_p11 = scmp.ne.s32.totalorder %s40_s20, %s1981_s29  ;;  %p1987_p13 = scmp.lt.s32.totalorder %s1981_s29, %s1981_s29 }
  0x1c   :  { %p1988_p0 = por %p1987_p13, %p1986_p12 }
  0x1e   :  { %p1989_p1 = pnand %p1988_p0, %p1982_p11 }
  0x20   :  { %1992 = shalt.err (!%p1989_p1)
}
  0x21   :  { %s2001_s2 = smov 64   ;;  %s2002_s28 = smov 4  }
  0x22   :  { %45 = dma.hbm_to_vmem [thread:$0]  %s2680_s4, 1024, %s40_s20, [#allocation7], %s2001_s2, %s2001_s2, %s2002_s28  }
  0x23   :  { %1993 = dma.done.wait [#allocation5], 4096  }
  0x24   :  { %1994 = vsyncadd [#allocation5], 4294963200 }
  0x25   :  { %1995 = dma.done.wait [#allocation7], 1024  }
  0x26   :  { %1996 = vsyncadd [#allocation7], 4294966272  ;;  %v2685_v0 = vmov 0   ;;  %v1717_v1 = vld [vmem:[%s2677_s1 + $0x4] ss:$16 sps:$4 sm:$0xff]   ;;  %vm157_vm0 = vcmask 261120   ;;  %v77_v45 = vlaneseq }
  0x27   :  { %202 = vmatprep.mubr.bf16.mxu0 %v2685_v0  ;;  %275 = vmatprep.mubr.bf16.mxu1 %v2685_v0  ;;  %v1719_v2 = vld [vmem:[%s2677_s1 + $0xc] ss:$16 sps:$4 sm:$0xff]   ;;  %v1721_v3 = vld [vmem:[%s2677_s1] ss:$16 sps:$4 sm:$0xff]   ;;  %v1722_v4 = vld [vmem:[%s2677_s1 + $0x8] ss:$16 sps:$4 sm:$0xff]  }
  0x28   :  { %170 = vmatprep.subr.bf16.mxu0 %v1717_v1  ;;  %243 = vmatprep.subr.bf16.mxu1 %v1719_v2  ;;  %v1723_v5 = vld [vmem:[%s2677_s1 + $0x24] ss:$16 sps:$4 sm:$0xff]   ;;  %v1725_v6 = vld [vmem:[%s2677_s1 + $0x2c] ss:$16 sps:$4 sm:$0xff]   ;;  %v1727_v7 = vld [vmem:[%s2677_s1 + $0x20] ss:$16 sps:$4 sm:$0xff]  }
  0x29   :  { %171 = vmatpush1.bf16.msra.mxu0 %v1721_v3  ;;  %244 = vmatpush1.bf16.msra.mxu1 %v1722_v4  ;;  %v1728_v8 = vld [vmem:[%s2677_s1 + $0x28] ss:$16 sps:$4 sm:$0xff]   ;;  %v1729_v9 = vld [vmem:[%s2676_s0] sm:$0xff]   ;;  %v2106_v11 = vld [vmem:[#allocation4 + $0xc] ss:$16 sps:$4 sm:$0xff]   ;;  %v78_v46 = vshrl.u32 %v77_v45, 7 }
  0x2a   :  { %172 = vmatprep.subr.bf16.mxu0 %v1723_v5  ;;  %245 = vmatprep.subr.bf16.mxu1 %v1725_v6  ;;  %v2104_v10 = vld [vmem:[#allocation4 + $0x4] ss:$16 sps:$4 sm:$0xff]   ;;  %v2108_v12 = vld [vmem:[#allocation4] ss:$16 sps:$4 sm:$0xff]   ;;  %v2110_v13 = vld [vmem:[#allocation4 + $0x8] ss:$16 sps:$4 sm:$0xff]  }
  0x2b   :  { %v2113_v14 = vld [vmem:[#allocation4 + $0x24] ss:$16 sps:$4 sm:$0xff]   ;;  %v2116_v15 = vld [vmem:[#allocation4 + $0x2c] ss:$16 sps:$4 sm:$0xff]   ;;  %v2120_v16 = vld [vmem:[#allocation4 + $0x20] ss:$16 sps:$4 sm:$0xff]  }
  0x2c   :  { %v2124_v17 = vld [vmem:[#allocation4 + $0x28] ss:$16 sps:$4 sm:$0xff]   ;;  %v2128_v18 = vld [vmem:[#allocation4 + $0x44] ss:$16 sps:$4 sm:$0xff]   ;;  %v2135_v20 = vld [vmem:[#allocation4 + $0x4c] ss:$16 sps:$4 sm:$0xff]  }
  0x2d   :  { %173 = vmatpush1.bf16.msra.mxu0 %v1727_v7  ;;  %246 = vmatpush1.bf16.msra.mxu1 %v1728_v8  ;;  %v1742_v19 = vld [vmem:[%s2676_s0 + $0x8] sm:$0xff]   ;;  %v2137_v21 = vld [vmem:[#allocation4 + $0x40] ss:$16 sps:$4 sm:$0xff]   ;;  %v2145_v23 = vld [vmem:[#allocation4 + $0x64] ss:$16 sps:$4 sm:$0xff]   ;;  %v87_v47 = vsub.s32 2, %v78_v46 }
  0x2e   :  { %544 = vmatprep.subr.bf16.mxu0 %v2104_v10  ;;  %585 = vmatprep.subr.bf16.mxu1 %v2106_v11  ;;  %v2141_v22 = vld [vmem:[#allocation4 + $0x48] ss:$16 sps:$4 sm:$0xff]   ;;  %v2147_v24 = vld [vmem:[#allocation4 + $0x6c] ss:$16 sps:$4 sm:$0xff]   ;;  %v2151_v25 = vld [vmem:[#allocation4 + $0x60] ss:$16 sps:$4 sm:$0xff]  }
  0x2f   :  { %v2155_v26 = vld [vmem:[#allocation4 + $0x68] ss:$16 sps:$4 sm:$0xff]   ;;  %v2159_v27 = vld [vmem:[#allocation4 + $0x84] ss:$16 sps:$4 sm:$0xff]   ;;  %v2161_v28 = vld [vmem:[#allocation4 + $0x8c] ss:$16 sps:$4 sm:$0xff]  }
  0x30   :  { %1605 = vmatmul.mubr.msk.bf16.vlgmr.msra.gmra.mrb[0].mxu0 %vm157_vm0, %v1729_v9  ;;  %1609 = vmatmul.mubr.msk.bf16.vlgmr.msra.gmra.mrb[0].mxu1 %vm157_vm0, %v1729_v9  ;;  %v1755_v29 = vld [vmem:[%s2676_s0 + $0x10] sm:$0xff]   ;;  %v2170_v31 = vld [vmem:[#allocation4 + $0x88] ss:$16 sps:$4 sm:$0xff]   ;;  %v2178_v33 = vld [vmem:[#allocation4 + $0xac] ss:$16 sps:$4 sm:$0xff]   ;;  %v91_v48 = vsub.s32 3, %v78_v46 }
  0x31   :  { %545 = vmatpush1.bf16.msra.mxu0 %v2108_v12  ;;  %586 = vmatpush1.bf16.msra.mxu1 %v2110_v13  ;;  %v2168_v30 = vld [vmem:[#allocation4 + $0x80] ss:$16 sps:$4 sm:$0xff]   ;;  %v2174_v32 = vld [vmem:[#allocation4 + $0xa4] ss:$16 sps:$4 sm:$0xff]   ;;  %v2184_v35 = vld [vmem:[#allocation4 + $0xa8] ss:$16 sps:$4 sm:$0xff]  }
  0x32   :  { %546 = vmatprep.subr.bf16.mxu0 %v2113_v14  ;;  %587 = vmatprep.subr.bf16.mxu1 %v2116_v15  ;;  %v2182_v34 = vld [vmem:[#allocation4 + $0xa0] ss:$16 sps:$4 sm:$0xff]   ;;  %v2188_v36 = vld [vmem:[#allocation4 + $0xc4] ss:$16 sps:$4 sm:$0xff]   ;;  %v2192_v37 = vld [vmem:[#allocation4 + $0xcc] ss:$16 sps:$4 sm:$0xff]  }
  0x33   :  { %212 = vmatprep.mubr.bf16.mxu0 %v2685_v0  ;;  %285 = vmatprep.mubr.bf16.mxu1 %v2685_v0  ;;  %v1768_v38 = vld [vmem:[%s2676_s0 + $0x18] sm:$0xff]   ;;  %v2199_v39 = vld [vmem:[#allocation4 + $0xc0] ss:$16 sps:$4 sm:$0xff]   ;;  %v2203_v41 = vld [vmem:[#allocation4 + $0xe4] ss:$16 sps:$4 sm:$0xff]   ;;  %v79_v49 = vsub.s32 0, %v78_v46 }
  0x34   :  { %v2201_v40 = vld [vmem:[#allocation4 + $0xc8] ss:$16 sps:$4 sm:$0xff]   ;;  %v2205_v42 = vld [vmem:[#allocation4 + $0xec] ss:$16 sps:$4 sm:$0xff]   ;;  %v2215_v43 = vld [vmem:[#allocation4 + $0xe0] ss:$16 sps:$4 sm:$0xff]  }
  0x35   :  { %547 = vmatpush1.bf16.msra.mxu0 %v2120_v16  ;;  %588 = vmatpush1.bf16.msra.mxu1 %v2124_v17  ;;  %v2217_v44 = vld [vmem:[#allocation4 + $0xe8] ss:$16 sps:$4 sm:$0xff]   ;;  %v75_v50 = vld [vmem:[%s2679_s3] sm:$0xf]  ;;  %v83_v51 = vsub.s32 1, %v78_v46  ;;  %vm2005_vm1 = vmmov 0  }
  0x36   :  { %548 = vmatprep.subr.bf16.mxu0 %v2128_v18  ;;  %589 = vmatprep.subr.bf16.mxu1 %v2135_v20  ;;  %v2266_v52 = vrot.slane %v75_v50, %v87_v47  ;;  %v2272_v55 = vrot.slane %v75_v50, %v91_v48  ;;  %v80_v56 = vrot.slane %v75_v50, %v79_v49  ;;  %vm1585_vm2 = vcmask 7168  }
  0x37   :  { %v84_v59 = vrot.slane %v75_v50, %v83_v51 }
  0x38   :  { %1606 = vmatmul.mubr.msk.bf16.gmra.mrb[4].mxu0 %vm157_vm0, %v1742_v19  ;;  %1610 = vmatmul.mubr.msk.bf16.gmra.mrb[4].mxu1 %vm157_vm0, %v1742_v19 }
  0x39   :  { %549 = vmatpush1.bf16.msra.mxu0 %v2137_v21  ;;  %590 = vmatpush1.bf16.msra.mxu1 %v2141_v22 }
  0x3a   :  { %550 = vmatprep.subr.bf16.mxu0 %v2145_v23  ;;  %591 = vmatprep.subr.bf16.mxu1 %v2147_v24 }
  0x3b   :  { %222 = vmatprep.mubr.bf16.mxu0 %v2685_v0  ;;  %295 = vmatprep.mubr.bf16.mxu1 %v2685_v0 }
  0x3d   :  { %551 = vmatpush1.bf16.msra.mxu0 %v2151_v25  ;;  %592 = vmatpush1.bf16.msra.mxu1 %v2155_v26 }
  0x3e   :  { %552 = vmatprep.subr.bf16.mxu0 %v2159_v27  ;;  %593 = vmatprep.subr.bf16.mxu1 %v2161_v28 }
  0x40   :  { %1607 = vmatmul.mubr.msk.bf16.gmra.mrb[8].mxu0 %vm157_vm0, %v1755_v29  ;;  %1611 = vmatmul.mubr.msk.bf16.gmra.mrb[8].mxu1 %vm157_vm0, %v1755_v29 }
  0x41   :  { %553 = vmatpush1.bf16.msra.mxu0 %v2168_v30  ;;  %594 = vmatpush1.bf16.msra.mxu1 %v2170_v31 }
  0x42   :  { %554 = vmatprep.subr.bf16.mxu0 %v2174_v32  ;;  %595 = vmatprep.subr.bf16.mxu1 %v2178_v33 }
  0x43   :  { %232 = vmatprep.mubr.bf16.mxu0 %v2685_v0  ;;  %305 = vmatprep.mubr.bf16.mxu1 %v2685_v0 }
  0x45   :  { %555 = vmatpush1.bf16.msra.mxu0 %v2182_v34  ;;  %596 = vmatpush1.bf16.msra.mxu1 %v2184_v35 }
  0x46   :  { %556 = vmatprep.subr.bf16.mxu0 %v2188_v36  ;;  %597 = vmatprep.subr.bf16.mxu1 %v2192_v37 }
  0x48   :  { %1608 = vmatmul.mubr.msk.bf16.gmra.mrb[12].mxu0 %vm157_vm0, %v1768_v38  ;;  %1612 = vmatmul.mubr.msk.bf16.gmra.mrb[12].mxu1 %vm157_vm0, %v1768_v38 }
  0x49   :  { %557 = vmatpush1.bf16.msra.mxu0 %v2199_v39  ;;  %598 = vmatpush1.bf16.msra.mxu1 %v2201_v40 }
  0x4a   :  { %558 = vmatprep.subr.bf16.mxu0 %v2203_v41  ;;  %599 = vmatprep.subr.bf16.mxu1 %v2205_v42 }
  0x4b   :  { %576 = vmatprep.mubr.bf16.mxu0 %v2685_v0  ;;  %617 = vmatprep.mubr.bf16.mxu1 %v2685_v0 }
  0x4d   :  { %559 = vmatpush1.bf16.msra.mxu0 %v2215_v43  ;;  %600 = vmatpush1.bf16.msra.mxu1 %v2217_v44 }
  0x4e   :  { %659 = vmatprep.subr.bf16.mxu0 %v2104_v10  ;;  %700 = vmatprep.subr.bf16.mxu1 %v2106_v11 }
  0x50   :  { %577 = vmatmul.mubr.bf16.vlgmr.msra.gmra.mrb[16].mxu0 %v2685_v0  ;;  %618 = vmatmul.mubr.bf16.vlgmr.msra.gmra.mrb[16].mxu1 %v2685_v0 }
  0x51   :  { %660 = vmatpush1.bf16.msra.mxu0 %v2108_v12  ;;  %701 = vmatpush1.bf16.msra.mxu1 %v2110_v13 }
  0x52   :  { %661 = vmatprep.subr.bf16.mxu0 %v2113_v14  ;;  %702 = vmatprep.subr.bf16.mxu1 %v2116_v15 }
  0x53   :  { %691 = vmatprep.mubr.bf16.mxu0 %v2685_v0  ;;  %732 = vmatprep.mubr.bf16.mxu1 %v2685_v0 }
  0x55   :  { %662 = vmatpush1.bf16.msra.mxu0 %v2120_v16  ;;  %703 = vmatpush1.bf16.msra.mxu1 %v2124_v17 }
  0x56   :  { %663 = vmatprep.subr.bf16.mxu0 %v2128_v18  ;;  %704 = vmatprep.subr.bf16.mxu1 %v2135_v20 }
  0x59   :  { %664 = vmatpush1.bf16.msra.mxu0 %v2137_v21  ;;  %705 = vmatpush1.bf16.msra.mxu1 %v2141_v22 }
  0x5a   :  { %665 = vmatprep.subr.bf16.mxu0 %v2145_v23  ;;  %706 = vmatprep.subr.bf16.mxu1 %v2147_v24 }
  0x5d   :  { %666 = vmatpush1.bf16.msra.mxu0 %v2151_v25  ;;  %707 = vmatpush1.bf16.msra.mxu1 %v2155_v26 }
  0x5e   :  { %667 = vmatprep.subr.bf16.mxu0 %v2159_v27  ;;  %708 = vmatprep.subr.bf16.mxu1 %v2161_v28 }
  0x61   :  { %668 = vmatpush1.bf16.msra.mxu0 %v2168_v30  ;;  %709 = vmatpush1.bf16.msra.mxu1 %v2170_v31 }
  0x62   :  { %669 = vmatprep.subr.bf16.mxu0 %v2174_v32  ;;  %710 = vmatprep.subr.bf16.mxu1 %v2178_v33 }
  0x65   :  { %670 = vmatpush1.bf16.msra.mxu0 %v2182_v34  ;;  %711 = vmatpush1.bf16.msra.mxu1 %v2184_v35 }
  0x66   :  { %671 = vmatprep.subr.bf16.mxu0 %v2188_v36  ;;  %712 = vmatprep.subr.bf16.mxu1 %v2192_v37 }
  0x69   :  { %672 = vmatpush1.bf16.msra.mxu0 %v2199_v39  ;;  %713 = vmatpush1.bf16.msra.mxu1 %v2201_v40 }
  0x6a   :  { %673 = vmatprep.subr.bf16.mxu0 %v2203_v41  ;;  %714 = vmatprep.subr.bf16.mxu1 %v2205_v42 }
  0x6d   :  { %674 = vmatpush1.bf16.msra.mxu0 %v2215_v43  ;;  %715 = vmatpush1.bf16.msra.mxu1 %v2217_v44 }
  0x6e   :  { %774 = vmatprep.subr.bf16.mxu0 %v2104_v10  ;;  %815 = vmatprep.subr.bf16.mxu1 %v2106_v11 }
 0x103   :  { %v2268_v53 = vpop.f32.mrb[0].mxu0  ;;  %v2270_v54 = vpop.f32.mrb[0].mxu1 }
 0x104   :  { %v206_v57 = vpop.f32.mrb[1].mxu0  ;;  %v279_v58 = vpop.f32.mrb[1].mxu1 }
 0x105   :  { %v208_v60 = vpop.f32.mrb[2].mxu0  ;;  %v281_v61 = vpop.f32.mrb[2].mxu1 }
 0x106   :  { %v2274_v62 = vadd.f32 %v208_v60, %v80_v56  ;;  %v210_v63 = vpop.f32.mrb[3].mxu0  ;;  %v2277_v1 = vadd.f32 %v281_v61, %v2266_v52  ;;  %v283_v2 = vpop.f32.mrb[3].mxu1 }
 0x107   :  { %v2279_v3 = vadd.f32 %v210_v63, %v84_v59  ;;  %v2282_v4 = vadd.f32 %v283_v2, %v2272_v55 }
 0x10b   :  { %v214_v5 = vpop.f32.mrb[4].mxu0  ;;  %v287_v6 = vpop.f32.mrb[4].mxu1 }
 0x10c   :  { %v2284_v7 = vadd.f32 %v214_v5, %v80_v56  ;;  %v216_v8 = vpop.f32.mrb[5].mxu0  ;;  %v2287_v9 = vadd.f32 %v287_v6, %v2266_v52  ;;  %v289_v19 = vpop.f32.mrb[5].mxu1 }
 0x10d   :  { %v2289_v29 = vadd.f32 %v216_v8, %v84_v59  ;;  %v218_v38 = vpop.f32.mrb[6].mxu0  ;;  %v2292_v45 = vadd.f32 %v289_v19, %v2272_v55  ;;  %v291_v46 = vpop.f32.mrb[6].mxu1 }
 0x10e   :  { %v2294_v47 = vadd.f32 %v218_v38, %v80_v56  ;;  %v220_v48 = vpop.f32.mrb[7].mxu0  ;;  %v2297_v49 = vadd.f32 %v291_v46, %v2266_v52  ;;  %v293_v50 = vpop.f32.mrb[7].mxu1 }
 0x10f   :  { %2687 = vst [vmem:[#allocation10_spill] sm:$0xff] %v2292_v45  ;;  %v2299_v51 = vadd.f32 %v220_v48, %v84_v59  ;;  %v2302_v60 = vadd.f32 %v293_v50, %v2272_v55 }
 0x110   :  { %2688 = vst [vmem:[#allocation11_spill] sm:$0xff] %v2294_v47  ;;  %2689 = vst [vmem:[#allocation12_spill] sm:$0xff] %v2297_v49 }
 0x111   :  { %2690 = vst [vmem:[#allocation13_spill] sm:$0xff] %v2299_v51  ;;  %2691 = vst [vmem:[#allocation14_spill] sm:$0xff] %v2302_v60 }
 0x113   :  { %v224_v61 = vpop.f32.mrb[8].mxu0  ;;  %v297_v63 = vpop.f32.mrb[8].mxu1 }
 0x114   :  { %v2304_v2 = vadd.f32 %v224_v61, %v80_v56  ;;  %v226_v5 = vpop.f32.mrb[9].mxu0  ;;  %v2307_v6 = vadd.f32 %v297_v63, %v2266_v52  ;;  %v299_v8 = vpop.f32.mrb[9].mxu1 }
 0x115   :  { %v2309_v19 = vadd.f32 %v226_v5, %v84_v59  ;;  %v228_v38 = vpop.f32.mrb[10].mxu0  ;;  %v2312_v46 = vadd.f32 %v299_v8, %v2272_v55  ;;  %v301_v48 = vpop.f32.mrb[10].mxu1 }
 0x116   :  { %2692 = vst [vmem:[#allocation15_spill] sm:$0xff] %v2304_v2  ;;  %2693 = vst [vmem:[#allocation16_spill] sm:$0xff] %v2307_v6  ;;  %v2314_v0 = vadd.f32 %v228_v38, %v80_v56  ;;  %v230_v50 = vpop.f32.mrb[11].mxu0  ;;  %v2317_v60 = vadd.f32 %v301_v48, %v2266_v52  ;;  %v303_v61 = vpop.f32.mrb[11].mxu1 }
 0x117   :  { %2694 = vst [vmem:[#allocation17_spill] sm:$0xff] %v2309_v19  ;;  %2695 = vst [vmem:[#allocation18_spill] sm:$0xff] %v2312_v46  ;;  %v2319_v2 = vadd.f32 %v230_v50, %v84_v59  ;;  %v2322_v63 = vadd.f32 %v303_v61, %v2272_v55 }
 0x118   :  { %2696 = vst [vmem:[#allocation19_spill] sm:$0xff] %v2314_v0  ;;  %2697 = vst [vmem:[#allocation20_spill] sm:$0xff] %v2317_v60 }
 0x119   :  { %2698 = vst [vmem:[#allocation21_spill] sm:$0xff] %v2319_v2  ;;  %2699 = vst [vmem:[#allocation22_spill] sm:$0xff] %v2322_v63 }
 0x11b   :  { %v234_v6 = vpop.f32.mrb[12].mxu0  ;;  %v307_v5 = vpop.f32.mrb[12].mxu1 }
 0x11c   :  { %v2324_v19 = vadd.f32 %v234_v6, %v80_v56  ;;  %v236_v51 = vpop.f32.mrb[13].mxu0  ;;  %v2327_v8 = vadd.f32 %v307_v5, %v2266_v52  ;;  %v309_v38 = vpop.f32.mrb[13].mxu1 }
 0x11d   :  { %v2329_v0 = vadd.f32 %v236_v51, %v84_v59  ;;  %v238_v46 = vpop.f32.mrb[14].mxu0  ;;  %v2332_v48 = vadd.f32 %v309_v38, %v2272_v55  ;;  %v311_v50 = vpop.f32.mrb[14].mxu1  ;;  %v205_v51 = vadd.f32 %v2268_v53, %v80_v56  ;;  %v207_v38 = vadd.f32 %v206_v57, %v84_v59 }
 0x11e   :  { %2700 = vst [vmem:[#allocation23_spill] sm:$0xff] %v2324_v19  ;;  %2701 = vst [vmem:[#allocation24_spill] sm:$0xff] %v2327_v8  ;;  %v2334_v2 = vadd.f32 %v238_v46, %v80_v56  ;;  %v240_v61 = vpop.f32.mrb[15].mxu0  ;;  %v2337_v63 = vadd.f32 %v311_v50, %v2266_v52  ;;  %v313_v6 = vpop.f32.mrb[15].mxu1 }
 0x11f   :  { %2702 = vst [vmem:[#allocation25_spill] sm:$0xff] %v2329_v0  ;;  %2703 = vst [vmem:[#allocation26_spill] sm:$0xff] %v2332_v48  ;;  %v2339_v19 = vadd.f32 %v240_v61, %v84_v59  ;;  %v2342_v5 = vadd.f32 %v313_v6, %v2272_v55  ;;  %v278_v0 = vadd.f32 %v2270_v54, %v2266_v52 }
 0x120   :  { %2704 = vst [vmem:[#allocation27_spill] sm:$0xff] %v2334_v2  ;;  %2705 = vst [vmem:[#allocation28_spill] sm:$0xff] %v2337_v63  ;;  %v280_v48 = vadd.f32 %v279_v58, %v2272_v55 }
 0x121   :  { %2706 = vst [vmem:[#allocation29_spill] sm:$0xff] %v2339_v19  ;;  %2707 = vst [vmem:[#allocation30_spill] sm:$0xff] %v2342_v5 }
 0x123   :  { %v578_v46 = vpop.f32.mrb[16].mxu0  ;;  %v619_v2 = vpop.f32.mrb[16].mxu1 }
 0x124   :  { %v626_v8 = vadd.f32 %v578_v46, %v205_v51  ;;  %v628_v60 = vadd.f32 %v619_v2, %v278_v0  ;;  %v580_v50 = vpop.f32.mrb[17].mxu0  ;;  %v621_v63 = vpop.f32.mrb[17].mxu1 }
 0x125   :  { %v627_v49 = vadd.f32 %v580_v50, %v207_v38  ;;  %v629_v61 = vadd.f32 %v621_v63, %v280_v48  ;;  %v582_v19 = vpop.f32.mrb[18].mxu0  ;;  %v623_v47 = vpop.f32.mrb[18].mxu1 }
 0x126   :  { %v1645_v6 = vmul.f32 -1.442695, %v626_v8  ;;  %v583_v5 = vpop.f32.mrb[19].mxu0  ;;  %v624_v45 = vpop.f32.mrb[19].mxu1  ;;  %v1647_v52 = vmul.f32 -1.442695, %v628_v60 }
 0x127   :  { %v1646_v53 = vmul.f32 -1.442695, %v627_v49  ;;  %v2708_v5 = vmov 0  }
 0x128   :  { %1789 = vpow2.f32 %v1645_v6 }
 0x129   :  { %1791 = vpow2.f32 %v1646_v53 }
 0x12a   :  { %1793 = vtanh.f32 %v629_v61 }
 0x12b   :  { %1795 = vpow2.f32 %v1647_v52 }
 0x132   :  { %v1790_v54 = vpop.eup %1789 }
 0x133   :  { %v639_v56 = vadd.f32 1.0, %v1790_v54  ;;  %v1792_v55 = vpop.eup %1791 }
 0x134   :  { %v640_v0 = vadd.f32 1.0, %v1792_v55  ;;  %v1794_v57 = vpop.eup %1793 }
 0x135   :  { %1797 = vrcp.f32 %v639_v56  ;;  %v1796_v58 = vpop.eup %1795 }
 0x136   :  { %1799 = vrcp.f32 %v640_v0  ;;  %v641_v19 = vadd.f32 1.0, %v1796_v58 }
 0x138   :  { %1801 = vrcp.f32 %v641_v19 }
 0x13f   :  { %v1798_v59 = vpop.eup %1797 }
 0x140   :  { %v650_v2 = vmul.f32 %v1798_v59, %v1794_v57  ;;  %v1800_v47 = vpop.eup %1799 }
 0x141   :  { %v649_v63 = vmul.f32 0.0, %v1800_v47 }
 0x142   :  { %v1802_v49 = vpop.eup %1801 }
 0x143   :  { %v2348_v45 = vadd.f32 %v650_v2, %v649_v63 }
 0x145   :  { %1803 = vtanh.f32 %v2348_v45 }
 0x14f   :  { %v1804_v60 = vpop.eup %1803 }
 0x150   :  { %v653_v8 = vmul.f32 %v1804_v60, %v1802_v49 }
 0x152   :  { %v658_v48 = vpack.c.bf16 %v653_v8, %v653_v8 }
 0x154   :  { %692 = vmatmul.mubr.bf16.vlgmr.msra.gmra.mrb[20].mxu0 %v658_v48  ;;  %733 = vmatmul.mubr.bf16.vlgmr.msra.gmra.mrb[20].mxu1 %v658_v48 }
 0x155   :  { %775 = vmatpush1.bf16.msra.mxu0 %v2108_v12  ;;  %816 = vmatpush1.bf16.msra.mxu1 %v2110_v13 }
 0x156   :  { %776 = vmatprep.subr.bf16.mxu0 %v2113_v14  ;;  %817 = vmatprep.subr.bf16.mxu1 %v2116_v15 }
 0x157   :  { %806 = vmatprep.mubr.bf16.mxu0 %v2708_v5  ;;  %847 = vmatprep.mubr.bf16.mxu1 %v2708_v5 }
 0x159   :  { %777 = vmatpush1.bf16.msra.mxu0 %v2120_v16  ;;  %818 = vmatpush1.bf16.msra.mxu1 %v2124_v17 }
 0x15a   :  { %778 = vmatprep.subr.bf16.mxu0 %v2128_v18  ;;  %819 = vmatprep.subr.bf16.mxu1 %v2135_v20 }
 0x15d   :  { %779 = vmatpush1.bf16.msra.mxu0 %v2137_v21  ;;  %820 = vmatpush1.bf16.msra.mxu1 %v2141_v22 }
 0x15e   :  { %780 = vmatprep.subr.bf16.mxu0 %v2145_v23  ;;  %821 = vmatprep.subr.bf16.mxu1 %v2147_v24 }
 0x161   :  { %781 = vmatpush1.bf16.msra.mxu0 %v2151_v25  ;;  %822 = vmatpush1.bf16.msra.mxu1 %v2155_v26 }
 0x162   :  { %782 = vmatprep.subr.bf16.mxu0 %v2159_v27  ;;  %823 = vmatprep.subr.bf16.mxu1 %v2161_v28 }
 0x165   :  { %783 = vmatpush1.bf16.msra.mxu0 %v2168_v30  ;;  %824 = vmatpush1.bf16.msra.mxu1 %v2170_v31 }
 0x166   :  { %784 = vmatprep.subr.bf16.mxu0 %v2174_v32  ;;  %825 = vmatprep.subr.bf16.mxu1 %v2178_v33 }
 0x169   :  { %785 = vmatpush1.bf16.msra.mxu0 %v2182_v34  ;;  %826 = vmatpush1.bf16.msra.mxu1 %v2184_v35 }
 0x16a   :  { %786 = vmatprep.subr.bf16.mxu0 %v2188_v36  ;;  %827 = vmatprep.subr.bf16.mxu1 %v2192_v37 }
 0x16d   :  { %787 = vmatpush1.bf16.msra.mxu0 %v2199_v39  ;;  %828 = vmatpush1.bf16.msra.mxu1 %v2201_v40 }
 0x16e   :  { %788 = vmatprep.subr.bf16.mxu0 %v2203_v41  ;;  %829 = vmatprep.subr.bf16.mxu1 %v2205_v42 }
 0x171   :  { %789 = vmatpush1.bf16.msra.mxu0 %v2215_v43  ;;  %830 = vmatpush1.bf16.msra.mxu1 %v2217_v44 }
 0x172   :  { %889 = vmatprep.subr.bf16.mxu0 %v2104_v10  ;;  %930 = vmatprep.subr.bf16.mxu1 %v2106_v11 }
 0x227   :  { %v693_v51 = vpop.f32.mrb[20].mxu0  ;;  %v734_v38 = vpop.f32.mrb[20].mxu1 }
 0x228   :  { %v741_v46 = vadd.f32 %v693_v51, %v2274_v62  ;;  %v743_v50 = vadd.f32 %v734_v38, %v2277_v1  ;;  %v695_v61 = vpop.f32.mrb[21].mxu0  ;;  %v736_v6 = vpop.f32.mrb[21].mxu1 }
 0x229   :  { %v742_v53 = vadd.f32 %v695_v61, %v2279_v3  ;;  %v744_v52 = vadd.f32 %v736_v6, %v2282_v4  ;;  %v697_v54 = vpop.f32.mrb[22].mxu0  ;;  %v738_v56 = vpop.f32.mrb[22].mxu1 }
 0x22a   :  { %v1648_v55 = vmul.f32 -1.442695, %v741_v46  ;;  %v698_v0 = vpop.f32.mrb[23].mxu0  ;;  %v739_v57 = vpop.f32.mrb[23].mxu1  ;;  %v1650_v59 = vmul.f32 -1.442695, %v743_v50 }
 0x22b   :  { %v1649_v58 = vmul.f32 -1.442695, %v742_v53 }
 0x22c   :  { %1805 = vpow2.f32 %v1648_v55  ;;  %v2709_v55 = vld [vmem:[#allocation10_spill] sm:$0xff] }
 0x22d   :  { %1807 = vpow2.f32 %v1649_v58 }
 0x22e   :  { %1809 = vtanh.f32 %v744_v52 }
 0x22f   :  { %1811 = vpow2.f32 %v1650_v59 }
 0x236   :  { %v1806_v2 = vpop.eup %1805 }
 0x237   :  { %v754_v47 = vadd.f32 1.0, %v1806_v2  ;;  %v1808_v62 = vpop.eup %1807 }
 0x238   :  { %v755_v1 = vadd.f32 1.0, %v1808_v62  ;;  %v1810_v3 = vpop.eup %1809 }
 0x239   :  { %1813 = vrcp.f32 %v754_v47  ;;  %v1812_v19 = vpop.eup %1811 }
 0x23a   :  { %1815 = vrcp.f32 %v755_v1  ;;  %v756_v60 = vadd.f32 1.0, %v1812_v19 }
 0x23c   :  { %1817 = vrcp.f32 %v756_v60 }
 0x243   :  { %v1814_v4 = vpop.eup %1813 }
 0x244   :  { %v765_v63 = vmul.f32 %v1814_v4, %v1810_v3  ;;  %v1816_v49 = vpop.eup %1815 }
 0x245   :  { %v764_v8 = vmul.f32 %v1816_v49, %v2348_v45 }
 0x246   :  { %v1818_v51 = vpop.eup %1817 }
 0x247   :  { %v2390_v48 = vadd.f32 %v765_v63, %v764_v8 }
 0x249   :  { %1819 = vtanh.f32 %v2390_v48 }
 0x253   :  { %v1820_v38 = vpop.eup %1819 }
 0x254   :  { %v768_v46 = vmul.f32 %v1820_v38, %v1818_v51 }
 0x256   :  { %v773_v50 = vpack.c.bf16 %v768_v46, %v768_v46 }
 0x258   :  { %807 = vmatmul.mubr.bf16.vlgmr.msra.gmra.mrb[24].mxu0 %v773_v50  ;;  %848 = vmatmul.mubr.bf16.vlgmr.msra.gmra.mrb[24].mxu1 %v773_v50 }
 0x259   :  { %890 = vmatpush1.bf16.msra.mxu0 %v2108_v12  ;;  %931 = vmatpush1.bf16.msra.mxu1 %v2110_v13 }
 0x25a   :  { %891 = vmatprep.subr.bf16.mxu0 %v2113_v14  ;;  %932 = vmatprep.subr.bf16.mxu1 %v2116_v15 }
 0x25b   :  { %921 = vmatprep.mubr.bf16.mxu0 %v2708_v5  ;;  %962 = vmatprep.mubr.bf16.mxu1 %v2708_v5 }
 0x25d   :  { %892 = vmatpush1.bf16.msra.mxu0 %v2120_v16  ;;  %933 = vmatpush1.bf16.msra.mxu1 %v2124_v17 }
 0x25e   :  { %893 = vmatprep.subr.bf16.mxu0 %v2128_v18  ;;  %934 = vmatprep.subr.bf16.mxu1 %v2135_v20 }
 0x261   :  { %894 = vmatpush1.bf16.msra.mxu0 %v2137_v21  ;;  %935 = vmatpush1.bf16.msra.mxu1 %v2141_v22 }
 0x262   :  { %895 = vmatprep.subr.bf16.mxu0 %v2145_v23  ;;  %936 = vmatprep.subr.bf16.mxu1 %v2147_v24 }
 0x265   :  { %896 = vmatpush1.bf16.msra.mxu0 %v2151_v25  ;;  %937 = vmatpush1.bf16.msra.mxu1 %v2155_v26 }
 0x266   :  { %897 = vmatprep.subr.bf16.mxu0 %v2159_v27  ;;  %938 = vmatprep.subr.bf16.mxu1 %v2161_v28 }
 0x269   :  { %898 = vmatpush1.bf16.msra.mxu0 %v2168_v30  ;;  %939 = vmatpush1.bf16.msra.mxu1 %v2170_v31 }
 0x26a   :  { %899 = vmatprep.subr.bf16.mxu0 %v2174_v32  ;;  %940 = vmatprep.subr.bf16.mxu1 %v2178_v33 }
 0x26d   :  { %900 = vmatpush1.bf16.msra.mxu0 %v2182_v34  ;;  %941 = vmatpush1.bf16.msra.mxu1 %v2184_v35 }
 0x26e   :  { %901 = vmatprep.subr.bf16.mxu0 %v2188_v36  ;;  %942 = vmatprep.subr.bf16.mxu1 %v2192_v37 }
 0x271   :  { %902 = vmatpush1.bf16.msra.mxu0 %v2199_v39  ;;  %943 = vmatpush1.bf16.msra.mxu1 %v2201_v40 }
 0x272   :  { %903 = vmatprep.subr.bf16.mxu0 %v2203_v41  ;;  %944 = vmatprep.subr.bf16.mxu1 %v2205_v42 }
 0x275   :  { %904 = vmatpush1.bf16.msra.mxu0 %v2215_v43  ;;  %945 = vmatpush1.bf16.msra.mxu1 %v2217_v44 }
 0x276   :  { %1004 = vmatprep.subr.bf16.mxu0 %v2104_v10  ;;  %1045 = vmatprep.subr.bf16.mxu1 %v2106_v11 }
 0x32b   :  { %v808_v45 = vpop.f32.mrb[24].mxu0  ;;  %v849_v61 = vpop.f32.mrb[24].mxu1 }
 0x32c   :  { %v856_v6 = vadd.f32 %v808_v45, %v2284_v7  ;;  %v858_v53 = vadd.f32 %v849_v61, %v2287_v9  ;;  %v810_v52 = vpop.f32.mrb[25].mxu0  ;;  %v851_v54 = vpop.f32.mrb[25].mxu1 }
 0x32d   :  { %v857_v56 = vadd.f32 %v810_v52, %v2289_v29  ;;  %v859_v0 = vadd.f32 %v851_v54, %v2709_v55  ;;  %v812_v57 = vpop.f32.mrb[26].mxu0  ;;  %v853_v58 = vpop.f32.mrb[26].mxu1  ;;  %v2711_v54 = vld [vmem:[#allocation12_spill] sm:$0xff] }
 0x32e   :  { %v1651_v59 = vmul.f32 -1.442695, %v856_v6  ;;  %v813_v2 = vpop.f32.mrb[27].mxu0  ;;  %v854_v47 = vpop.f32.mrb[27].mxu1  ;;  %v1653_v1 = vmul.f32 -1.442695, %v858_v53 }
 0x32f   :  { %v1652_v62 = vmul.f32 -1.442695, %v857_v56  ;;  %v2710_v53 = vld [vmem:[#allocation11_spill] sm:$0xff]  ;;  %v2712_v57 = vld [vmem:[#allocation13_spill] sm:$0xff] }
 0x330   :  { %1821 = vpow2.f32 %v1651_v59  ;;  %v2713_v59 = vld [vmem:[#allocation14_spill] sm:$0xff] }
 0x331   :  { %1823 = vpow2.f32 %v1652_v62 }
 0x332   :  { %1825 = vtanh.f32 %v859_v0 }
 0x333   :  { %1827 = vpow2.f32 %v1653_v1 }
 0x33a   :  { %v1822_v3 = vpop.eup %1821 }
 0x33b   :  { %v869_v19 = vadd.f32 1.0, %v1822_v3  ;;  %v1824_v7 = vpop.eup %1823 }
 0x33c   :  { %v870_v9 = vadd.f32 1.0, %v1824_v7  ;;  %v1826_v29 = vpop.eup %1825 }
 0x33d   :  { %1829 = vrcp.f32 %v869_v19  ;;  %v1828_v4 = vpop.eup %1827 }
 0x33e   :  { %1831 = vrcp.f32 %v870_v9  ;;  %v871_v8 = vadd.f32 1.0, %v1828_v4 }
 0x340   :  { %1833 = vrcp.f32 %v871_v8 }
 0x347   :  { %v1830_v63 = vpop.eup %1829 }
 0x348   :  { %v880_v49 = vmul.f32 %v1830_v63, %v1826_v29  ;;  %v1832_v60 = vpop.eup %1831 }
 0x349   :  { %v879_v51 = vmul.f32 %v1832_v60, %v2390_v48 }
 0x34a   :  { %v1834_v46 = vpop.eup %1833 }
 0x34b   :  { %v2432_v38 = vadd.f32 %v880_v49, %v879_v51 }
 0x34d   :  { %1835 = vtanh.f32 %v2432_v38 }
 0x357   :  { %v1836_v50 = vpop.eup %1835 }
 0x358   :  { %v883_v45 = vmul.f32 %v1836_v50, %v1834_v46 }
 0x35a   :  { %v888_v61 = vpack.c.bf16 %v883_v45, %v883_v45 }
 0x35c   :  { %922 = vmatmul.mubr.bf16.vlgmr.msra.gmra.mrb[28].mxu0 %v888_v61  ;;  %963 = vmatmul.mubr.bf16.vlgmr.msra.gmra.mrb[28].mxu1 %v888_v61 }
 0x35d   :  { %1005 = vmatpush1.bf16.msra.mxu0 %v2108_v12  ;;  %1046 = vmatpush1.bf16.msra.mxu1 %v2110_v13 }
 0x35e   :  { %1006 = vmatprep.subr.bf16.mxu0 %v2113_v14  ;;  %1047 = vmatprep.subr.bf16.mxu1 %v2116_v15 }
 0x35f   :  { %1036 = vmatprep.mubr.bf16.mxu0 %v2708_v5  ;;  %1077 = vmatprep.mubr.bf16.mxu1 %v2708_v5 }
 0x361   :  { %1007 = vmatpush1.bf16.msra.mxu0 %v2120_v16  ;;  %1048 = vmatpush1.bf16.msra.mxu1 %v2124_v17 }
 0x362   :  { %1008 = vmatprep.subr.bf16.mxu0 %v2128_v18  ;;  %1049 = vmatprep.subr.bf16.mxu1 %v2135_v20 }
 0x365   :  { %1009 = vmatpush1.bf16.msra.mxu0 %v2137_v21  ;;  %1050 = vmatpush1.bf16.msra.mxu1 %v2141_v22 }
 0x366   :  { %1010 = vmatprep.subr.bf16.mxu0 %v2145_v23  ;;  %1051 = vmatprep.subr.bf16.mxu1 %v2147_v24 }
 0x369   :  { %1011 = vmatpush1.bf16.msra.mxu0 %v2151_v25  ;;  %1052 = vmatpush1.bf16.msra.mxu1 %v2155_v26 }
 0x36a   :  { %1012 = vmatprep.subr.bf16.mxu0 %v2159_v27  ;;  %1053 = vmatprep.subr.bf16.mxu1 %v2161_v28 }
 0x36d   :  { %1013 = vmatpush1.bf16.msra.mxu0 %v2168_v30  ;;  %1054 = vmatpush1.bf16.msra.mxu1 %v2170_v31 }
 0x36e   :  { %1014 = vmatprep.subr.bf16.mxu0 %v2174_v32  ;;  %1055 = vmatprep.subr.bf16.mxu1 %v2178_v33 }
 0x371   :  { %1015 = vmatpush1.bf16.msra.mxu0 %v2182_v34  ;;  %1056 = vmatpush1.bf16.msra.mxu1 %v2184_v35 }
 0x372   :  { %1016 = vmatprep.subr.bf16.mxu0 %v2188_v36  ;;  %1057 = vmatprep.subr.bf16.mxu1 %v2192_v37 }
 0x375   :  { %1017 = vmatpush1.bf16.msra.mxu0 %v2199_v39  ;;  %1058 = vmatpush1.bf16.msra.mxu1 %v2201_v40 }
 0x376   :  { %1018 = vmatprep.subr.bf16.mxu0 %v2203_v41  ;;  %1059 = vmatprep.subr.bf16.mxu1 %v2205_v42 }
 0x379   :  { %1019 = vmatpush1.bf16.msra.mxu0 %v2215_v43  ;;  %1060 = vmatpush1.bf16.msra.mxu1 %v2217_v44 }
 0x37a   :  { %1119 = vmatprep.subr.bf16.mxu0 %v2104_v10  ;;  %1160 = vmatprep.subr.bf16.mxu1 %v2106_v11 }
 0x42f   :  { %v923_v48 = vpop.f32.mrb[28].mxu0  ;;  %v964_v6 = vpop.f32.mrb[28].mxu1 }
 0x430   :  { %v971_v52 = vadd.f32 %v923_v48, %v2710_v53  ;;  %v973_v56 = vadd.f32 %v964_v6, %v2711_v54  ;;  %v925_v55 = vpop.f32.mrb[29].mxu0  ;;  %v966_v0 = vpop.f32.mrb[29].mxu1 }
 0x431   :  { %v972_v58 = vadd.f32 %v925_v55, %v2712_v57  ;;  %v974_v2 = vadd.f32 %v966_v0, %v2713_v59  ;;  %v927_v47 = vpop.f32.mrb[30].mxu0  ;;  %v968_v62 = vpop.f32.mrb[30].mxu1 }
 0x432   :  { %v1654_v1 = vmul.f32 -1.442695, %v971_v52  ;;  %v928_v3 = vpop.f32.mrb[31].mxu0  ;;  %v969_v19 = vpop.f32.mrb[31].mxu1  ;;  %v1656_v11 = vmul.f32 -1.442695, %v973_v56 }
 0x433   :  { %v1655_v10 = vmul.f32 -1.442695, %v972_v58  ;;  %v2526_v47 = vld [vmem:[#allocation4 + $0x8] ss:$16 sps:$4 sm:$0xff]   ;;  %v2529_v62 = vld [vmem:[#allocation4 + $0x24] ss:$16 sps:$4 sm:$0xff]  }
 0x434   :  { %1837 = vpow2.f32 %v1654_v1  ;;  %v2532_v1 = vld [vmem:[#allocation4 + $0x2c] ss:$16 sps:$4 sm:$0xff]   ;;  %v2537_v3 = vld [vmem:[#allocation4 + $0x20] ss:$16 sps:$4 sm:$0xff]   ;;  %v2540_v19 = vld [vmem:[#allocation4 + $0x28] ss:$16 sps:$4 sm:$0xff]  }
 0x435   :  { %1839 = vpow2.f32 %v1655_v10  ;;  %v2543_v10 = vld [vmem:[#allocation4 + $0x44] ss:$16 sps:$4 sm:$0xff]  }
 0x436   :  { %1841 = vtanh.f32 %v974_v2  ;;  %v2523_v2 = vld [vmem:[#allocation4] ss:$16 sps:$4 sm:$0xff]  }
 0x437   :  { %1843 = vpow2.f32 %v1656_v11  ;;  %v2546_v11 = vld [vmem:[#allocation4 + $0x4c] ss:$16 sps:$4 sm:$0xff]  }
 0x43e   :  { %v1838_v7 = vpop.eup %1837 }
 0x43f   :  { %v984_v9 = vadd.f32 1.0, %v1838_v7  ;;  %v1840_v29 = vpop.eup %1839  ;;  %v2549_v7 = vld [vmem:[#allocation4 + $0x40] ss:$16 sps:$4 sm:$0xff]  }
 0x440   :  { %v985_v4 = vadd.f32 1.0, %v1840_v29  ;;  %v1842_v63 = vpop.eup %1841  ;;  %v2555_v29 = vld [vmem:[#allocation4 + $0x64] ss:$16 sps:$4 sm:$0xff]  }
 0x441   :  { %1845 = vrcp.f32 %v984_v9  ;;  %v1844_v49 = vpop.eup %1843  ;;  %v2552_v9 = vld [vmem:[#allocation4 + $0x48] ss:$16 sps:$4 sm:$0xff]  }
 0x442   :  { %1847 = vrcp.f32 %v985_v4  ;;  %v986_v46 = vadd.f32 1.0, %v1844_v49  ;;  %v2558_v4 = vld [vmem:[#allocation4 + $0x6c] ss:$16 sps:$4 sm:$0xff]   ;;  %v2564_v49 = vld [vmem:[#allocation4 + $0x68] ss:$16 sps:$4 sm:$0xff]  }
 0x444   :  { %1849 = vrcp.f32 %v986_v46  ;;  %v2576_v46 = vld [vmem:[#allocation4 + $0x88] ss:$16 sps:$4 sm:$0xff]  }
 0x44b   :  { %v1846_v60 = vpop.eup %1845 }
 0x44c   :  { %v995_v8 = vmul.f32 %v1846_v60, %v1842_v63  ;;  %v1848_v51 = vpop.eup %1847  ;;  %v2561_v63 = vld [vmem:[#allocation4 + $0x60] ss:$16 sps:$4 sm:$0xff]   ;;  %v2567_v60 = vld [vmem:[#allocation4 + $0x84] ss:$16 sps:$4 sm:$0xff]  }
 0x44d   :  { %v994_v50 = vmul.f32 %v1848_v51, %v2432_v38  ;;  %v2573_v51 = vld [vmem:[#allocation4 + $0x80] ss:$16 sps:$4 sm:$0xff]  }
 0x44e   :  { %v1850_v61 = vpop.eup %1849 }
 0x44f   :  { %v2474_v45 = vadd.f32 %v995_v8, %v994_v50  ;;  %v2570_v8 = vld [vmem:[#allocation4 + $0x8c] ss:$16 sps:$4 sm:$0xff]   ;;  %v2579_v50 = vld [vmem:[#allocation4 + $0xa4] ss:$16 sps:$4 sm:$0xff]  }
 0x451   :  { %1851 = vtanh.f32 %v2474_v45 }
 0x45b   :  { %v1852_v48 = vpop.eup %1851 }
 0x45c   :  { %v998_v6 = vmul.f32 %v1852_v48, %v1850_v61  ;;  %v2585_v61 = vld [vmem:[#allocation4 + $0xa0] ss:$16 sps:$4 sm:$0xff]   ;;  %v2588_v48 = vld [vmem:[#allocation4 + $0xa8] ss:$16 sps:$4 sm:$0xff]  }
 0x45e   :  { %v1003_v53 = vpack.c.bf16 %v998_v6, %v998_v6  ;;  %v2591_v6 = vld [vmem:[#allocation4 + $0xc4] ss:$16 sps:$4 sm:$0xff]  }
 0x460   :  { %1037 = vmatmul.mubr.bf16.vlgmr.msra.gmra.mrb[32].mxu0 %v1003_v53  ;;  %1078 = vmatmul.mubr.bf16.vlgmr.msra.gmra.mrb[32].mxu1 %v1003_v53  ;;  %v2594_v53 = vld [vmem:[#allocation4 + $0xcc] ss:$16 sps:$4 sm:$0xff]  }
 0x461   :  { %1120 = vmatpush1.bf16.msra.mxu0 %v2108_v12  ;;  %1161 = vmatpush1.bf16.msra.mxu1 %v2110_v13  ;;  %v2509_v12 = vld [vmem:[#allocation4 + $0x4] ss:$16 sps:$4 sm:$0xff]   ;;  %v2512_v13 = vld [vmem:[#allocation4 + $0xc] ss:$16 sps:$4 sm:$0xff]  }
 0x462   :  { %1121 = vmatprep.subr.bf16.mxu0 %v2113_v14  ;;  %1162 = vmatprep.subr.bf16.mxu1 %v2116_v15 }
 0x463   :  { %1151 = vmatprep.mubr.bf16.mxu0 %v2708_v5  ;;  %1192 = vmatprep.mubr.bf16.mxu1 %v2708_v5 }
 0x465   :  { %1122 = vmatpush1.bf16.msra.mxu0 %v2120_v16  ;;  %1163 = vmatpush1.bf16.msra.mxu1 %v2124_v17  ;;  %v2714_v16 = vld [vmem:[#allocation15_spill] sm:$0xff] }
 0x466   :  { %1123 = vmatprep.subr.bf16.mxu0 %v2128_v18  ;;  %1164 = vmatprep.subr.bf16.mxu1 %v2135_v20  ;;  %v2715_v18 = vld [vmem:[#allocation16_spill] sm:$0xff] }
 0x469   :  { %1124 = vmatpush1.bf16.msra.mxu0 %v2137_v21  ;;  %1165 = vmatpush1.bf16.msra.mxu1 %v2141_v22 }
 0x46a   :  { %1125 = vmatprep.subr.bf16.mxu0 %v2145_v23  ;;  %1166 = vmatprep.subr.bf16.mxu1 %v2147_v24  ;;  %v2716_v23 = vld [vmem:[#allocation17_spill] sm:$0xff] }
 0x46d   :  { %1126 = vmatpush1.bf16.msra.mxu0 %v2151_v25  ;;  %1167 = vmatpush1.bf16.msra.mxu1 %v2155_v26  ;;  %v2717_v25 = vld [vmem:[#allocation18_spill] sm:$0xff] }
 0x46e   :  { %1127 = vmatprep.subr.bf16.mxu0 %v2159_v27  ;;  %1168 = vmatprep.subr.bf16.mxu1 %v2161_v28 }
 0x471   :  { %1128 = vmatpush1.bf16.msra.mxu0 %v2168_v30  ;;  %1169 = vmatpush1.bf16.msra.mxu1 %v2170_v31 }
 0x472   :  { %1129 = vmatprep.subr.bf16.mxu0 %v2174_v32  ;;  %1170 = vmatprep.subr.bf16.mxu1 %v2178_v33 }
 0x475   :  { %1130 = vmatpush1.bf16.msra.mxu0 %v2182_v34  ;;  %1171 = vmatpush1.bf16.msra.mxu1 %v2184_v35 }
 0x476   :  { %1131 = vmatprep.subr.bf16.mxu0 %v2188_v36  ;;  %1172 = vmatprep.subr.bf16.mxu1 %v2192_v37 }
 0x479   :  { %1132 = vmatpush1.bf16.msra.mxu0 %v2199_v39  ;;  %1173 = vmatpush1.bf16.msra.mxu1 %v2201_v40 }
 0x47a   :  { %1133 = vmatprep.subr.bf16.mxu0 %v2203_v41  ;;  %1174 = vmatprep.subr.bf16.mxu1 %v2205_v42 }
 0x47d   :  { %1134 = vmatpush1.bf16.msra.mxu0 %v2215_v43  ;;  %1175 = vmatpush1.bf16.msra.mxu1 %v2217_v44 }
 0x47e   :  { %1234 = vmatprep.subr.bf16.mxu0 %v2509_v12  ;;  %1275 = vmatprep.subr.bf16.mxu1 %v2512_v13 }
 0x533   :  { %v1038_v14 = vpop.f32.mrb[32].mxu0  ;;  %v1079_v15 = vpop.f32.mrb[32].mxu1 }
 0x534   :  { %v1086_v17 = vadd.f32 %v1038_v14, %v2714_v16  ;;  %v1088_v20 = vadd.f32 %v1079_v15, %v2715_v18  ;;  %v1040_v21 = vpop.f32.mrb[33].mxu0  ;;  %v1081_v22 = vpop.f32.mrb[33].mxu1  ;;  %v2597_v14 = vld [vmem:[#allocation4 + $0xc0] ss:$16 sps:$4 sm:$0xff]   ;;  %v2600_v15 = vld [vmem:[#allocation4 + $0xc8] ss:$16 sps:$4 sm:$0xff]  }
 0x535   :  { %v1087_v24 = vadd.f32 %v1040_v21, %v2716_v23  ;;  %v1089_v26 = vadd.f32 %v1081_v22, %v2717_v25  ;;  %v1042_v27 = vpop.f32.mrb[34].mxu0  ;;  %v1083_v28 = vpop.f32.mrb[34].mxu1  ;;  %v2603_v16 = vld [vmem:[#allocation4 + $0xe4] ss:$16 sps:$4 sm:$0xff]   ;;  %v2718_v21 = vld [vmem:[#allocation19_spill] sm:$0xff] }
 0x536   :  { %v1657_v30 = vmul.f32 -1.442695, %v1086_v17  ;;  %v1043_v31 = vpop.f32.mrb[35].mxu0  ;;  %v1084_v32 = vpop.f32.mrb[35].mxu1  ;;  %v1659_v34 = vmul.f32 -1.442695, %v1088_v20 }
 0x537   :  { %v1658_v33 = vmul.f32 -1.442695, %v1087_v24  ;;  %v2606_v17 = vld [vmem:[#allocation4 + $0xec] ss:$16 sps:$4 sm:$0xff]   ;;  %v2719_v23 = vld [vmem:[#allocation20_spill] sm:$0xff] }
 0x538   :  { %1853 = vpow2.f32 %v1657_v30  ;;  %v2720_v27 = vld [vmem:[#allocation21_spill] sm:$0xff]  ;;  %v2721_v30 = vld [vmem:[#allocation22_spill] sm:$0xff] }
 0x539   :  { %1855 = vpow2.f32 %v1658_v33 }
 0x53a   :  { %1857 = vtanh.f32 %v1089_v26 }
 0x53b   :  { %1859 = vpow2.f32 %v1659_v34 }
 0x542   :  { %v1854_v35 = vpop.eup %1853 }
 0x543   :  { %v1099_v36 = vadd.f32 1.0, %v1854_v35  ;;  %v1856_v37 = vpop.eup %1855 }
 0x544   :  { %v1100_v39 = vadd.f32 1.0, %v1856_v37  ;;  %v1858_v40 = vpop.eup %1857 }
 0x545   :  { %1861 = vrcp.f32 %v1099_v36  ;;  %v1860_v41 = vpop.eup %1859 }
 0x546   :  { %1863 = vrcp.f32 %v1100_v39  ;;  %v1101_v54 = vadd.f32 1.0, %v1860_v41 }
 0x548   :  { %1865 = vrcp.f32 %v1101_v54 }
 0x54f   :  { %v1862_v42 = vpop.eup %1861 }
 0x550   :  { %v1110_v38 = vmul.f32 %v1862_v42, %v1858_v40  ;;  %v1864_v52 = vpop.eup %1863 }
 0x551   :  { %v1109_v56 = vmul.f32 %v1864_v52, %v2474_v45  ;;  %v2582_v45 = vld [vmem:[#allocation4 + $0xac] ss:$16 sps:$4 sm:$0xff]  }
 0x552   :  { %v1866_v0 = vpop.eup %1865 }
 0x553   :  { %v2520_v55 = vadd.f32 %v1110_v38, %v1109_v56 }
 0x555   :  { %1867 = vtanh.f32 %v2520_v55 }
 0x55f   :  { %v1868_v57 = vpop.eup %1867 }
 0x560   :  { %v1113_v58 = vmul.f32 %v1868_v57, %v1866_v0 }
 0x562   :  { %v1118_v59 = vpack.c.bf16 %v1113_v58, %v1113_v58 }
 0x564   :  { %1152 = vmatmul.mubr.bf16.vlgmr.msra.gmra.mrb[36].mxu0 %v1118_v59  ;;  %1193 = vmatmul.mubr.bf16.vlgmr.msra.gmra.mrb[36].mxu1 %v1118_v59 }
 0x565   :  { %1235 = vmatpush1.bf16.msra.mxu0 %v2523_v2  ;;  %1276 = vmatpush1.bf16.msra.mxu1 %v2526_v47 }
 0x566   :  { %1236 = vmatprep.subr.bf16.mxu0 %v2529_v62  ;;  %1277 = vmatprep.subr.bf16.mxu1 %v2532_v1 }
 0x567   :  { %1266 = vmatprep.mubr.bf16.mxu0 %v2708_v5  ;;  %1307 = vmatprep.mubr.bf16.mxu1 %v2708_v5 }
 0x569   :  { %1237 = vmatpush1.bf16.msra.mxu0 %v2537_v3  ;;  %1278 = vmatpush1.bf16.msra.mxu1 %v2540_v19 }
 0x56a   :  { %1238 = vmatprep.subr.bf16.mxu0 %v2543_v10  ;;  %1279 = vmatprep.subr.bf16.mxu1 %v2546_v11 }
 0x56d   :  { %1239 = vmatpush1.bf16.msra.mxu0 %v2549_v7  ;;  %1280 = vmatpush1.bf16.msra.mxu1 %v2552_v9 }
 0x56e   :  { %1240 = vmatprep.subr.bf16.mxu0 %v2555_v29  ;;  %1281 = vmatprep.subr.bf16.mxu1 %v2558_v4 }
 0x571   :  { %1241 = vmatpush1.bf16.msra.mxu0 %v2561_v63  ;;  %1282 = vmatpush1.bf16.msra.mxu1 %v2564_v49 }
 0x572   :  { %1242 = vmatprep.subr.bf16.mxu0 %v2567_v60  ;;  %1283 = vmatprep.subr.bf16.mxu1 %v2570_v8 }
 0x575   :  { %1243 = vmatpush1.bf16.msra.mxu0 %v2573_v51  ;;  %1284 = vmatpush1.bf16.msra.mxu1 %v2576_v46 }
 0x576   :  { %1244 = vmatprep.subr.bf16.mxu0 %v2579_v50  ;;  %1285 = vmatprep.subr.bf16.mxu1 %v2582_v45 }
 0x579   :  { %1245 = vmatpush1.bf16.msra.mxu0 %v2585_v61  ;;  %1286 = vmatpush1.bf16.msra.mxu1 %v2588_v48 }
 0x57a   :  { %1246 = vmatprep.subr.bf16.mxu0 %v2591_v6  ;;  %1287 = vmatprep.subr.bf16.mxu1 %v2594_v53 }
 0x57d   :  { %1247 = vmatpush1.bf16.msra.mxu0 %v2597_v14  ;;  %1288 = vmatpush1.bf16.msra.mxu1 %v2600_v15 }
 0x57e   :  { %1248 = vmatprep.subr.bf16.mxu0 %v2603_v16  ;;  %1289 = vmatprep.subr.bf16.mxu1 %v2606_v17 }
 0x581   :  { %1249 = vmatpush1.bf16.msra.mxu0 %v2215_v43  ;;  %1290 = vmatpush1.bf16.msra.mxu1 %v2217_v44 }
 0x582   :  { %1349 = vmatprep.subr.bf16.mxu0 %v2509_v12  ;;  %1390 = vmatprep.subr.bf16.mxu1 %v2512_v13 }
 0x637   :  { %v1153_v18 = vpop.f32.mrb[36].mxu0  ;;  %v1194_v20 = vpop.f32.mrb[36].mxu1 }
 0x638   :  { %v1201_v22 = vadd.f32 %v1153_v18, %v2718_v21  ;;  %v1203_v24 = vadd.f32 %v1194_v20, %v2719_v23  ;;  %v1155_v25 = vpop.f32.mrb[37].mxu0  ;;  %v1196_v26 = vpop.f32.mrb[37].mxu1 }
 0x639   :  { %v1202_v28 = vadd.f32 %v1155_v25, %v2720_v27  ;;  %v1204_v31 = vadd.f32 %v1196_v26, %v2721_v30  ;;  %v1157_v32 = vpop.f32.mrb[38].mxu0  ;;  %v1198_v43 = vpop.f32.mrb[38].mxu1  ;;  %v1781_v27 = vld [vmem:[#allocation6] sm:$0xff]   ;;  %v1782_v30 = vld [vmem:[#allocation6 + $0x8] sm:$0xff]  }
 0x63a   :  { %v1660_v33 = vmul.f32 -1.442695, %v1201_v22  ;;  %v1158_v44 = vpop.f32.mrb[39].mxu0  ;;  %v1199_v34 = vpop.f32.mrb[39].mxu1  ;;  %v1662_v13 = vmul.f32 -1.442695, %v1203_v24 }
 0x63b   :  { %v1661_v12 = vmul.f32 -1.442695, %v1202_v28  ;;  %v2004_v28 = vmov 0.0   ;;  %v1784_v32 = vld [vmem:[#allocation6 + $0x18] sm:$0xff]   ;;  %v1785_v43 = vld [vmem:[#allocation6 + $0x20] sm:$0xff]   ;;  %v1787_v44 = vld [vmem:[#allocation6 + $0x30] sm:$0xff]  }
 0x63c   :  { %1869 = vpow2.f32 %v1660_v33  ;;  %v1786_v33 = vld [vmem:[#allocation6 + $0x28] sm:$0xff]   ;;  %v1788_v34 = vld [vmem:[#allocation6 + $0x38] sm:$0xff]  }
 0x63d   :  { %1871 = vpow2.f32 %v1661_v12 }
 0x63e   :  { %1873 = vtanh.f32 %v1204_v31  ;;  %v1783_v31 = vld [vmem:[#allocation6 + $0x10] sm:$0xff]  }
 0x63f   :  { %1875 = vpow2.f32 %v1662_v13 }
 0x646   :  { %v1870_v35 = vpop.eup %1869 }
 0x647   :  { %v1214_v36 = vadd.f32 1.0, %v1870_v35  ;;  %v1872_v37 = vpop.eup %1871  ;;  %v2726_v35 = vld [vmem:[#allocation27_spill] sm:$0xff] }
 0x648   :  { %v1215_v39 = vadd.f32 1.0, %v1872_v37  ;;  %v1874_v40 = vpop.eup %1873  ;;  %v2727_v37 = vld [vmem:[#allocation28_spill] sm:$0xff] }
 0x649   :  { %1877 = vrcp.f32 %v1214_v36  ;;  %v1876_v41 = vpop.eup %1875 }
 0x64a   :  { %1879 = vrcp.f32 %v1215_v39  ;;  %v1216_v54 = vadd.f32 1.0, %v1876_v41 }
 0x64c   :  { %1881 = vrcp.f32 %v1216_v54 }
 0x653   :  { %v1878_v42 = vpop.eup %1877 }
 0x654   :  { %v1225_v38 = vmul.f32 %v1878_v42, %v1874_v40  ;;  %v1880_v52 = vpop.eup %1879  ;;  %v2728_v42 = vld [vmem:[#allocation29_spill] sm:$0xff] }
 0x655   :  { %v1224_v56 = vmul.f32 %v1880_v52, %v2520_v55  ;;  %v1948_v55 = vld [vmem:[#allocation4 + $0xe8] ss:$16 sps:$4 sm:$0xff]   ;;  %v2729_v52 = vld [vmem:[#allocation30_spill] sm:$0xff] }
 0x656   :  { %v1882_v57 = vpop.eup %1881 }
 0x657   :  { %v2618_v0 = vadd.f32 %v1225_v38, %v1224_v56 }
 0x659   :  { %1883 = vtanh.f32 %v2618_v0 }
 0x663   :  { %v1884_v58 = vpop.eup %1883 }
 0x664   :  { %v1228_v59 = vmul.f32 %v1884_v58, %v1882_v57 }
 0x666   :  { %v1233_v18 = vpack.c.bf16 %v1228_v59, %v1228_v59 }
 0x668   :  { %1267 = vmatmul.mubr.bf16.vlgmr.msra.gmra.mrb[40].mxu0 %v1233_v18  ;;  %1308 = vmatmul.mubr.bf16.vlgmr.msra.gmra.mrb[40].mxu1 %v1233_v18 }
 0x669   :  { %1350 = vmatpush1.bf16.msra.mxu0 %v2523_v2  ;;  %1391 = vmatpush1.bf16.msra.mxu1 %v2526_v47 }
 0x66a   :  { %1351 = vmatprep.subr.bf16.mxu0 %v2529_v62  ;;  %1392 = vmatprep.subr.bf16.mxu1 %v2532_v1  ;;  %v2722_v62 = vld [vmem:[#allocation23_spill] sm:$0xff] }
 0x66b   :  { %1381 = vmatprep.mubr.bf16.mxu0 %v2708_v5  ;;  %1422 = vmatprep.mubr.bf16.mxu1 %v2708_v5  ;;  %v1947_v5 = vld [vmem:[#allocation4 + $0xe0] ss:$16 sps:$4 sm:$0xff]  }
 0x66d   :  { %1352 = vmatpush1.bf16.msra.mxu0 %v2537_v3  ;;  %1393 = vmatpush1.bf16.msra.mxu1 %v2540_v19  ;;  %v2723_v3 = vld [vmem:[#allocation24_spill] sm:$0xff] }
 0x66e   :  { %1353 = vmatprep.subr.bf16.mxu0 %v2543_v10  ;;  %1394 = vmatprep.subr.bf16.mxu1 %v2546_v11 }
 0x671   :  { %1354 = vmatpush1.bf16.msra.mxu0 %v2549_v7  ;;  %1395 = vmatpush1.bf16.msra.mxu1 %v2552_v9  ;;  %v2724_v7 = vld [vmem:[#allocation25_spill] sm:$0xff] }
 0x672   :  { %1355 = vmatprep.subr.bf16.mxu0 %v2555_v29  ;;  %1396 = vmatprep.subr.bf16.mxu1 %v2558_v4  ;;  %v2725_v29 = vld [vmem:[#allocation26_spill] sm:$0xff] }
 0x675   :  { %1356 = vmatpush1.bf16.msra.mxu0 %v2561_v63  ;;  %1397 = vmatpush1.bf16.msra.mxu1 %v2564_v49 }
 0x676   :  { %1357 = vmatprep.subr.bf16.mxu0 %v2567_v60  ;;  %1398 = vmatprep.subr.bf16.mxu1 %v2570_v8 }
 0x679   :  { %1358 = vmatpush1.bf16.msra.mxu0 %v2573_v51  ;;  %1399 = vmatpush1.bf16.msra.mxu1 %v2576_v46 }
 0x67a   :  { %1359 = vmatprep.subr.bf16.mxu0 %v2579_v50  ;;  %1400 = vmatprep.subr.bf16.mxu1 %v2582_v45 }
 0x67d   :  { %1360 = vmatpush1.bf16.msra.mxu0 %v2585_v61  ;;  %1401 = vmatpush1.bf16.msra.mxu1 %v2588_v48 }
 0x67e   :  { %1361 = vmatprep.subr.bf16.mxu0 %v2591_v6  ;;  %1402 = vmatprep.subr.bf16.mxu1 %v2594_v53 }
 0x681   :  { %1362 = vmatpush1.bf16.msra.mxu0 %v2597_v14  ;;  %1403 = vmatpush1.bf16.msra.mxu1 %v2600_v15 }
 0x682   :  { %1363 = vmatprep.subr.bf16.mxu0 %v2603_v16  ;;  %1404 = vmatprep.subr.bf16.mxu1 %v2606_v17 }
 0x685   :  { %1364 = vmatpush1.bf16.msra.mxu0 %v1947_v5  ;;  %1405 = vmatpush1.bf16.msra.mxu1 %v1948_v55 }
 0x686   :  { %1688 = vmatprep.subr.bf16.mxu0 %v2004_v28 }
 0x73b   :  { %v1268_v2 = vpop.f32.mrb[40].mxu0  ;;  %v1309_v47 = vpop.f32.mrb[40].mxu1 }
 0x73c   :  { %v1316_v1 = vadd.f32 %v1268_v2, %v2722_v62  ;;  %v1318_v19 = vadd.f32 %v1309_v47, %v2723_v3  ;;  %v1270_v10 = vpop.f32.mrb[41].mxu0  ;;  %v1311_v11 = vpop.f32.mrb[41].mxu1 }
 0x73d   :  { %v1317_v9 = vadd.f32 %v1270_v10, %v2724_v7  ;;  %v1319_v4 = vadd.f32 %v1311_v11, %v2725_v29  ;;  %v1272_v63 = vpop.f32.mrb[42].mxu0  ;;  %v1313_v49 = vpop.f32.mrb[42].mxu1 }
 0x73e   :  { %v1663_v60 = vmul.f32 -1.442695, %v1316_v1  ;;  %v1273_v8 = vpop.f32.mrb[43].mxu0  ;;  %v1314_v51 = vpop.f32.mrb[43].mxu1  ;;  %v1665_v50 = vmul.f32 -1.442695, %v1318_v19 }
 0x73f   :  { %v1664_v46 = vmul.f32 -1.442695, %v1317_v9  ;;  %v1669_v8 = vld [vmem:[%s2681_s5] ss:$0 sm:$0xff] }
 0x740   :  { %1885 = vpow2.f32 %v1663_v60 }
 0x741   :  { %1887 = vpow2.f32 %v1664_v46 }
 0x742   :  { %1889 = vtanh.f32 %v1319_v4 }
 0x743   :  { %1891 = vpow2.f32 %v1665_v50 }
 0x74a   :  { %v1886_v45 = vpop.eup %1885 }
 0x74b   :  { %v1329_v61 = vadd.f32 1.0, %v1886_v45  ;;  %v1888_v48 = vpop.eup %1887 }
 0x74c   :  { %v1330_v6 = vadd.f32 1.0, %v1888_v48  ;;  %v1890_v53 = vpop.eup %1889 }
 0x74d   :  { %1893 = vrcp.f32 %v1329_v61  ;;  %v1892_v14 = vpop.eup %1891  ;;  %v1678_v61 = vld [vmem:[%s2682_s6] ss:$0 sm:$0xff] }
 0x74e   :  { %1895 = vrcp.f32 %v1330_v6  ;;  %v1331_v20 = vadd.f32 1.0, %v1892_v14  ;;  %v1583_v14 = vstv %s2683_s7 }
 0x750   :  { %1897 = vrcp.f32 %v1331_v20 }
 0x757   :  { %v1894_v15 = vpop.eup %1893 }
 0x758   :  { %v1340_v16 = vmul.f32 %v1894_v15, %v1890_v53  ;;  %v1896_v17 = vpop.eup %1895 }
 0x759   :  { %v1339_v21 = vmul.f32 %v1896_v17, %v2618_v0 }
 0x75a   :  { %v1898_v23 = vpop.eup %1897 }
 0x75b   :  { %v2656_v22 = vadd.f32 %v1340_v16, %v1339_v21 }
 0x75d   :  { %1899 = vtanh.f32 %v2656_v22 }
 0x767   :  { %v1900_v24 = vpop.eup %1899 }
 0x768   :  { %v1343_v25 = vmul.f32 %v1900_v24, %v1898_v23 }
 0x76a   :  { %v1348_v26 = vpack.c.bf16 %v1343_v25, %v1343_v25 }
 0x76c   :  { %1382 = vmatmul.mubr.bf16.vlgmr.msra.gmra.mrb[44].mxu0 %v1348_v26  ;;  %1423 = vmatmul.mubr.bf16.vlgmr.msra.gmra.mrb[44].mxu1 %v1348_v26 }
 0x76d   :  { %1689 = vmatpush3.bf16.msra.mxu0 %v1781_v27  ;;  %1704 = vmatprep.mubr.msk.bf16.mxu0 %vm2005_vm1, %v2004_v28 }
 0x76e   :  { %1690 = vmatprep.subr.bf16.mxu0 %v2004_v28 }
 0x771   :  { %1691 = vmatpush3.bf16.msra.mxu0 %v1782_v30 }
 0x772   :  { %1692 = vmatprep.subr.bf16.mxu0 %v2004_v28 }
 0x775   :  { %1693 = vmatpush3.bf16.msra.mxu0 %v1783_v31 }
 0x776   :  { %1694 = vmatprep.subr.bf16.mxu0 %v2004_v28 }
 0x779   :  { %1695 = vmatpush3.bf16.msra.mxu0 %v1784_v32 }
 0x77a   :  { %1696 = vmatprep.subr.bf16.mxu0 %v2004_v28 }
 0x77d   :  { %1697 = vmatpush3.bf16.msra.mxu0 %v1785_v43 }
 0x77e   :  { %1698 = vmatprep.subr.bf16.mxu0 %v2004_v28 }
 0x781   :  { %1699 = vmatpush3.bf16.msra.mxu0 %v1786_v33 }
 0x782   :  { %1700 = vmatprep.subr.bf16.mxu0 %v2004_v28 }
 0x785   :  { %1701 = vmatpush3.bf16.msra.mxu0 %v1787_v44 }
 0x786   :  { %1702 = vmatprep.subr.bf16.mxu0 %v2004_v28 }
 0x789   :  { %1703 = vmatpush3.bf16.msra.mxu0 %v1788_v34 }
 0x83f   :  { %v1383_v12 = vpop.f32.mrb[44].mxu0  ;;  %v1424_v13 = vpop.f32.mrb[44].mxu1 }
 0x840   :  { %v1431_v36 = vadd.f32 %v1383_v12, %v2726_v35  ;;  %v1433_v39 = vadd.f32 %v1424_v13, %v2727_v37  ;;  %v1385_v40 = vpop.f32.mrb[45].mxu0  ;;  %v1426_v41 = vpop.f32.mrb[45].mxu1 }
 0x841   :  { %v1432_v38 = vadd.f32 %v1385_v40, %v2728_v42  ;;  %v1434_v54 = vadd.f32 %v1426_v41, %v2729_v52  ;;  %v1387_v56 = vpop.f32.mrb[46].mxu0  ;;  %v1428_v0 = vpop.f32.mrb[46].mxu1 }
 0x842   :  { %v1666_v57 = vmul.f32 -1.442695, %v1431_v36  ;;  %v1388_v58 = vpop.f32.mrb[47].mxu0  ;;  %v1429_v59 = vpop.f32.mrb[47].mxu1  ;;  %v1668_v5 = vmul.f32 -1.442695, %v1433_v39 }
 0x843   :  { %v1667_v18 = vmul.f32 -1.442695, %v1432_v38 }
 0x844   :  { %1901 = vpow2.f32 %v1666_v57 }
 0x845   :  { %1903 = vpow2.f32 %v1667_v18 }
 0x846   :  { %1905 = vtanh.f32 %v1434_v54 }
 0x847   :  { %1907 = vpow2.f32 %v1668_v5 }
 0x84e   :  { %v1902_v55 = vpop.eup %1901 }
 0x84f   :  { %v1444_v2 = vadd.f32 1.0, %v1902_v55  ;;  %v1904_v47 = vpop.eup %1903 }
 0x850   :  { %v1445_v62 = vadd.f32 1.0, %v1904_v47  ;;  %v1906_v1 = vpop.eup %1905 }
 0x851   :  { %1909 = vrcp.f32 %v1444_v2  ;;  %v1908_v3 = vpop.eup %1907 }
 0x852   :  { %1911 = vrcp.f32 %v1445_v62  ;;  %v1446_v7 = vadd.f32 1.0, %v1908_v3 }
 0x854   :  { %1913 = vrcp.f32 %v1446_v7 }
 0x85b   :  { %v1910_v19 = vpop.eup %1909 }
 0x85c   :  { %v1455_v10 = vmul.f32 %v1910_v19, %v1906_v1  ;;  %v1912_v11 = vpop.eup %1911 }
 0x85d   :  { %v1454_v9 = vmul.f32 %v1912_v11, %v2656_v22 }
 0x85e   :  { %v1914_v4 = vpop.eup %1913 }
 0x85f   :  { %v1456_v29 = vadd.f32 %v1455_v10, %v1454_v9 }
 0x861   :  { %1915 = vtanh.f32 %v1456_v29 }
 0x86b   :  { %v1916_v63 = vpop.eup %1915 }
 0x86c   :  { %v1458_v49 = vmul.f32 %v1916_v63, %v1914_v4 }
 0x86e   :  { %v1459_v60 = vpack.c.bf16 %v1458_v49, %v1458_v49 }
 0x870   :  { %1705 = vmatmul.mubr.bf16.vlgmr.msra.gmra.mrb[48].mxu0 %v1459_v60 }
 0x943   :  { %v1565_v51 = vpop.f32.mrb[48].mxu0 }
 0x944   :  { %v1566_v46 = vadd.f32 %v1669_v8, %v1565_v51  ;;  %v1706_v50 = vpop.f32.mrb[49].mxu0 }
 0x945   :  { %v1568_v45 = vpop.f32.mrb[50].mxu0 }
 0x946   :  { %v1571_v48 = vmax.f32 %v1566_v46, 0.0  ;;  %v1707_v6 = vpop.f32.mrb[51].mxu0 }
 0x948   :  { %v1579_v53 = vmul.f32 %v1678_v61, %v1571_v48 }
 0x94a   :  { %1580 = vadd.xlane.f32.xlu0 %v1579_v53 }
 0x9d7   :  { %v1581_v15 = vpop.xlane.xlu0 %1580 }
 0x9d8   :  { %v1584_v16 = vadd.f32 %v1583_v14, %v1581_v15 }
 0x9da   :  { %1586 = vst.msk [vmem:[%s2684_s8] sm:$0xff] %vm1585_vm2, %v1584_v16 }
 0x9db   :  { %1591 = vsyncpa [#allocation5], 1 }
 0x9dc   :  { %1592 = vsyncpa [#allocation7], 1 }

</bundles_post_ra>
